<compile_context>
chip_gen: v7x
topology: tpu7x:2x2x1
jax: 0.10.0
libtpu: 0.0.40
codegen_flags: <defaults>
</compile_context>

<pallas_src>
import jax
import jax.numpy as jnp
from jax.experimental import pallas as pl
from jax.experimental.pallas import tpu as pltpu


def _pick_tile(n, preferred=512):
    """Largest multiple of 128 that divides n and is <= preferred; else the full n."""
    best = None
    t = 128
    while t <= min(n, preferred):
        if n % t == 0:
            best = t
        t += 128
    return best if best is not None else n


def _nonlocal_flash_kernel(xq_ref, xkv_ref, gamma_ref, beta_ref,
                           wq_ref, wk_ref, wv_ref, wo_ref, out_ref,
                           q_sc, k_sc, v_sc, m_sc, l_sc, acc_sc):
    """One grid step = (batch b, query tile qi, kv tile ki); ki is the reduction axis."""
    qi = pl.program_id(1)
    ki = pl.program_id(2)
    nk = pl.num_programs(2)
    tkv = xkv_ref.shape[2]
    kv_start = pl.multiple_of(ki * tkv, tkv)

    gamma = gamma_ref[...]                   # (C, 1) f32
    beta = beta_ref[...]                     # (C, 1) f32

    def layernorm_cf(x_ct):
        # LayerNorm over the channel (sublane) axis on a channels-first (C, T) tile.
        x = x_ct.astype(jnp.float32)
        mu = jnp.mean(x, axis=0, keepdims=True)                       # (1, T)
        var = jnp.mean(jnp.square(x - mu), axis=0, keepdims=True)     # (1, T)
        xn = (x - mu) * jax.lax.rsqrt(var + 1e-5)
        return xn * gamma + beta                                       # (C, T) f32

    # ---- K/V projection: done exactly once per (batch, kv tile), during the qi == 0 sweep.
    @pl.when(qi == 0)
    def _fill_kv():
        xkn = layernorm_cf(xkv_ref[0])                                  # (C, TKV)
        k_sc[:, pl.ds(kv_start, tkv)] = jnp.dot(
            wk_ref[...], xkn, preferred_element_type=jnp.float32)       # (C, TKV)
        v_sc[:, pl.ds(kv_start, tkv)] = jnp.dot(
            wv_ref[...], xkn, preferred_element_type=jnp.float32)       # (C, TKV)

    # ---- Q projection + flash-state init: once per (batch, query tile).
    @pl.when(ki == 0)
    def _init():
        xqn = layernorm_cf(xq_ref[0])                                   # (C, TQ)
        # Softmax scale c^-0.5 is folded into wq in the wrapper.
        q_sc[...] = jnp.dot(wq_ref[...], xqn,
                            preferred_element_type=jnp.float32)         # (C, TQ)
        m_sc[...] = jnp.full(m_sc.shape, -jnp.inf, dtype=jnp.float32)
        l_sc[...] = jnp.zeros(l_sc.shape, dtype=jnp.float32)
        acc_sc[...] = jnp.zeros(acc_sc.shape, dtype=jnp.float32)

    k_ct = k_sc[:, pl.ds(kv_start, tkv)]                                # (C, TKV)
    v_ct = v_sc[:, pl.ds(kv_start, tkv)]                                # (C, TKV)

    # Scores, transposed so the softmax reduction is over sublanes and the running
    # stats stay lane-dense: s_T[k, q] = sum_c K[c,k] * Q[c,q].
    s_t = jax.lax.dot_general(k_ct, q_sc[...], (((0,), (0,)), ((), ())),
                              preferred_element_type=jnp.float32)       # (TKV, TQ)

    # Online (flash) softmax update in f32 with (1, TQ) stats.
    m_prev = m_sc[...]                                                  # (1, TQ)
    m_new = jnp.maximum(m_prev, jnp.max(s_t, axis=0, keepdims=True))    # (1, TQ)
    alpha = jnp.exp(m_prev - m_new)                                     # (1, TQ)
    p = jnp.exp(s_t - m_new)                                            # (TKV, TQ)
    l_sc[...] = alpha * l_sc[...] + jnp.sum(p, axis=0, keepdims=True)
    acc_sc[...] = alpha * acc_sc[...] + jnp.dot(
        v_ct, p, preferred_element_type=jnp.float32)                    # (C, TQ)
    m_sc[...] = m_new

    @pl.when(ki == nk - 1)
    def _finalize():
        inv_l = 1.0 / l_sc[...]                                         # (1, TQ)
        attn_ct = acc_sc[...] * inv_l                                   # (C, TQ)
        # Output projection (torch (out, in) weight layout -> plain wo @ attn).
        out_ct = jnp.dot(wo_ref[...], attn_ct,
                         preferred_element_type=jnp.float32)            # (C, TQ)
        out_ref[0] = (out_ct + xq_ref[0].astype(jnp.float32)).astype(out_ref.dtype)


def nonlocal_block(x_nchw, gamma, beta, wqkv, wo, *, tq=None, tkv=None,
                   vmem_limit_bytes=64 * 1024 * 1024):
    """NonLocalBlock forward.  x_nchw: (B, C, H, W) -> (B, C, H, W)."""
    B, C, H, W = x_nchw.shape
    N = H * W
    if tq is None:
        tq = _pick_tile(N)
    if tkv is None:
        tkv = _pick_tile(N)
    assert N % tq == 0 and N % tkv == 0
    # NOTE: if N has no 128-multiple divisor, _pick_tile falls back to the full N
    # (single tile); fine for small images, pad N with masking for large awkward N.

    # NCHW is already (B, C, N) row-major: this reshape is free (no HBM transpose).
    x_cn = x_nchw.reshape(B, C, N)

    # Weight prep (plain JAX, once).  torch Linear weights are (out, in):
    # fold the softmax scale c^-0.5 into the Q weight; split K/V so no mid-tile slicing
    # is needed in-kernel.
    scale = float(C) ** -0.5
    wq = (wqkv[:C] * scale).astype(jnp.float32)        # (C, C)
    wk = wqkv[C:2 * C].astype(jnp.float32)             # (C, C)
    wv = wqkv[2 * C:3 * C].astype(jnp.float32)         # (C, C)
    wo_f = wo.astype(jnp.float32)                      # (C, C)

    gamma_c1 = gamma.reshape(C, 1).astype(jnp.float32)
    beta_c1 = beta.reshape(C, 1).astype(jnp.float32)

    grid = (B, N // tq, N // tkv)

    out_cn = pl.pallas_call(
        _nonlocal_flash_kernel,
        out_shape=jax.ShapeDtypeStruct((B, C, N), x_nchw.dtype),
        grid_spec=pltpu.PrefetchScalarGridSpec(
            num_scalar_prefetch=0,
            grid=grid,
            in_specs=[
                # Query-side x tile (also the residual).
                pl.BlockSpec((1, C, tq), lambda b, qi, ki: (b, 0, qi)),
                # KV-side x tile: only needed while filling the K/V scratch (qi == 0);
                # afterwards the index collapses to block 0 so the DMA is skipped.
                pl.BlockSpec((1, C, tkv),
                             lambda b, qi, ki: (b, 0, jnp.where(qi == 0, ki, 0))),
                pl.BlockSpec((C, 1), lambda b, qi, ki: (0, 0)),     # LN gamma
                pl.BlockSpec((C, 1), lambda b, qi, ki: (0, 0)),     # LN beta
                pl.BlockSpec((C, C), lambda b, qi, ki: (0, 0)),     # Wq (scale folded)
                pl.BlockSpec((C, C), lambda b, qi, ki: (0, 0)),     # Wk
                pl.BlockSpec((C, C), lambda b, qi, ki: (0, 0)),     # Wv
                pl.BlockSpec((C, C), lambda b, qi, ki: (0, 0)),     # Wo
            ],
            out_specs=pl.BlockSpec((1, C, tq), lambda b, qi, ki: (b, 0, qi)),
            scratch_shapes=[
                pltpu.VMEM((C, tq), jnp.float32),   # Q tile (channels-first)
                pltpu.VMEM((C, N), jnp.float32),    # K for the whole image (persistent)
                pltpu.VMEM((C, N), jnp.float32),    # V for the whole image (persistent)
                pltpu.VMEM((1, tq), jnp.float32),   # running max  m (lane-dense)
                pltpu.VMEM((1, tq), jnp.float32),   # running sum  l (lane-dense)
                pltpu.VMEM((C, tq), jnp.float32),   # output accumulator (channels-first)
            ],
        ),
        compiler_params=pltpu.CompilerParams(
            # Batch is megacore-shardable; qi/ki must stay sequential on a core because the
            # K/V scratch is filled during the qi == 0 sweep and reused by later qi.
            dimension_semantics=("parallel", "arbitrary", "arbitrary"),
            vmem_limit_bytes=vmem_limit_bytes,
        ),
    )(x_cn, x_cn, gamma_c1, beta_c1, wq, wk, wv, wo_f)

    return out_cn.reshape(B, C, H, W)


def _reference(x_nchw, gamma, beta, wqkv, wo):
    """Pure-JAX f32 reference mirroring the PyTorch forward."""
    B, C, H, W = x_nchw.shape
    x = jnp.transpose(x_nchw.reshape(B, C, H * W), (0, 2, 1)).astype(jnp.float32)
    shortcut = x
    mean = jnp.mean(x, axis=-1, keepdims=True)
    var = jnp.mean((x - mean) ** 2, axis=-1, keepdims=True)
    xn = (x - mean) / jnp.sqrt(var + 1e-5) * gamma + beta
    qkv = jnp.einsum('bnc,oc->bno', xn, wqkv.astype(jnp.float32))
    q, k, v = jnp.split(qkv, 3, axis=-1)
    s = jnp.einsum('bqc,bkc->bqk', q, k) * (float(C) ** -0.5)
    p = jax.nn.softmax(s, axis=-1)
    out = jnp.einsum('bqk,bkc->bqc', p, v)
    out = jnp.einsum('bnc,oc->bno', out, wo.astype(jnp.float32))
    out = out + shortcut
    return jnp.transpose(out, (0, 2, 1)).reshape(B, C, H, W).astype(x_nchw.dtype)


if __name__ == "__main__":
    key = jax.random.PRNGKey(0)
    k_x, k_w1, k_w2 = jax.random.split(key, 3)

    B, C, H, W = 2, 4, 16, 16
    x = jax.random.normal(k_x, (B, C, H, W), dtype=jnp.float32)

    # Deterministic synthetic parameters (shapes follow nn.Linear / nn.LayerNorm).
    wqkv = jax.random.normal(k_w1, (3 * C, C), dtype=jnp.float32) * (1.0 / (C ** 0.5))
    wo = jax.random.normal(k_w2, (C, C), dtype=jnp.float32) * (1.0 / (C ** 0.5))
    gamma = jnp.ones((C,), dtype=jnp.float32)
    beta = jnp.zeros((C,), dtype=jnp.float32)

    # tq = tkv = 128 -> grid (2, 2, 2): exercises the online-softmax accumulation across
    # KV tiles AND the "fill K/V scratch at qi==0, reuse at qi==1" path.
    out = nonlocal_block(x, gamma, beta, wqkv, wo, tq=128, tkv=128)
    out = jax.block_until_ready(out)

    ref = jax.block_until_ready(_reference(x, gamma, beta, wqkv, wo))
    assert out.shape == (B, C, H, W)
    err = float(jnp.max(jnp.abs(out - ref)))
    assert jnp.allclose(out, ref, atol=5e-3, rtol=5e-3), err

    print("KERNEL_OK")
</pallas_src>

<mosaic_0001>
module attributes {stable_mosaic.version = 11 : i64} {
  func.func @_nonlocal_flash_kernel(%arg0: i32, %arg1: i32, %arg2: i32, %arg3: memref<1x4x128xf32, #tpu.memory_space<vmem>>, %arg4: memref<1x4x128xf32, #tpu.memory_space<vmem>>, %arg5: memref<4x1xf32, #tpu.memory_space<vmem>>, %arg6: memref<4x1xf32, #tpu.memory_space<vmem>>, %arg7: memref<4x4xf32, #tpu.memory_space<vmem>>, %arg8: memref<4x4xf32, #tpu.memory_space<vmem>>, %arg9: memref<4x4xf32, #tpu.memory_space<vmem>>, %arg10: memref<4x4xf32, #tpu.memory_space<vmem>>, %arg11: memref<1x4x128xf32, #tpu.memory_space<vmem>>, %arg12: memref<4x128xf32, #tpu.memory_space<vmem>>, %arg13: memref<4x256xf32, #tpu.memory_space<vmem>>, %arg14: memref<4x256xf32, #tpu.memory_space<vmem>>, %arg15: memref<1x128xf32, #tpu.memory_space<vmem>>, %arg16: memref<1x128xf32, #tpu.memory_space<vmem>>, %arg17: memref<4x128xf32, #tpu.memory_space<vmem>>) attributes {dimension_semantics = [#tpu.dimension_semantics<parallel>, #tpu.dimension_semantics<arbitrary>, #tpu.dimension_semantics<arbitrary>], iteration_bounds = array<i64: 2, 2, 2>, scalar_prefetch = 0 : i64, scratch_operands = 6 : i64, tpu.core_type = #tpu.core_type<tc>, window_params = [{transform_indices = @transform_0, window_bounds = array<i64: 1, 4, 128>}, {transform_indices = @transform_1, window_bounds = array<i64: 1, 4, 128>}, {pipeline_mode = #tpu.pipeline_mode<synchronous>, transform_indices = @transform_2, window_bounds = array<i64: 4, 1>}, {pipeline_mode = #tpu.pipeline_mode<synchronous>, transform_indices = @transform_3, window_bounds = array<i64: 4, 1>}, {pipeline_mode = #tpu.pipeline_mode<synchronous>, transform_indices = @transform_4, window_bounds = array<i64: 4, 4>}, {pipeline_mode = #tpu.pipeline_mode<synchronous>, transform_indices = @transform_5, window_bounds = array<i64: 4, 4>}, {pipeline_mode = #tpu.pipeline_mode<synchronous>, transform_indices = @transform_6, window_bounds = array<i64: 4, 4>}, {pipeline_mode = #tpu.pipeline_mode<synchronous>, transform_indices = @transform_7, window_bounds = array<i64: 4, 4>}, {transform_indices = @transform_8, window_bounds = array<i64: 1, 4, 128>}]} {
    %c128_i32 = arith.constant 128 : i32
    %0 = arith.muli %arg2, %c128_i32 : i32
    %1 = tpu.assume_multiple %0, 128 : i32
    %c0 = arith.constant 0 : index
    %c0_0 = arith.constant 0 : index
    %2 = vector.load %arg5[%c0, %c0_0] : memref<4x1xf32, #tpu.memory_space<vmem>>, vector<4x1xf32>
    %c0_1 = arith.constant 0 : index
    %c0_2 = arith.constant 0 : index
    %3 = vector.load %arg6[%c0_1, %c0_2] : memref<4x1xf32, #tpu.memory_space<vmem>>, vector<4x1xf32>
    %c0_i32 = arith.constant 0 : i32
    %4 = arith.cmpi eq, %arg1, %c0_i32 : i32
    %5 = arith.extui %4 : i1 to i32
    %c0_i32_3 = arith.constant 0 : i32
    %6 = arith.cmpi ne, %5, %c0_i32_3 : i32
    scf.if %6 {
      %c0_26 = arith.constant 0 : index
      %c0_27 = arith.constant 0 : index
      %c0_28 = arith.constant 0 : index
      %41 = vector.load %arg4[%c0_26, %c0_27, %c0_28] : memref<1x4x128xf32, #tpu.memory_space<vmem>>, vector<1x4x128xf32>
      %42 = vector.shape_cast %41 : vector<1x4x128xf32> to vector<4x128xf32>
      %cst_29 = arith.constant dense<0.000000e+00> : vector<128xf32>
      %43 = vector.multi_reduction <add>, %42, %cst_29 [0] : vector<4x128xf32> to vector<128xf32>
      %44 = vector.shape_cast %43 : vector<128xf32> to vector<1x128xf32>
      %cst_30 = arith.constant 4.000000e+00 : f32
      %45 = vector.broadcast %cst_30 : f32 to vector<1x128xf32>
      %46 = arith.divf %44, %45 : vector<1x128xf32>
      %47 = vector.broadcast %46 : vector<1x128xf32> to vector<4x128xf32>
      %48 = arith.subf %42, %47 : vector<4x128xf32>
      %49 = arith.mulf %48, %48 : vector<4x128xf32>
      %cst_31 = arith.constant dense<0.000000e+00> : vector<128xf32>
      %50 = vector.multi_reduction <add>, %49, %cst_31 [0] : vector<4x128xf32> to vector<128xf32>
      %51 = vector.shape_cast %50 : vector<128xf32> to vector<1x128xf32>
      %cst_32 = arith.constant 4.000000e+00 : f32
      %52 = vector.broadcast %cst_32 : f32 to vector<1x128xf32>
      %53 = arith.divf %51, %52 : vector<1x128xf32>
      %54 = vector.broadcast %46 : vector<1x128xf32> to vector<4x128xf32>
      %55 = arith.subf %42, %54 : vector<4x128xf32>
      %cst_33 = arith.constant 9.99999974E-6 : f32
      %56 = vector.broadcast %cst_33 : f32 to vector<1x128xf32>
      %57 = arith.addf %53, %56 : vector<1x128xf32>
      %58 = math.rsqrt %57 : vector<1x128xf32>
      %59 = vector.broadcast %58 : vector<1x128xf32> to vector<4x128xf32>
      %60 = arith.mulf %55, %59 : vector<4x128xf32>
      %61 = vector.broadcast %2 : vector<4x1xf32> to vector<4x128xf32>
      %62 = arith.mulf %60, %61 : vector<4x128xf32>
      %63 = vector.broadcast %3 : vector<4x1xf32> to vector<4x128xf32>
      %64 = arith.addf %62, %63 : vector<4x128xf32>
      %c0_34 = arith.constant 0 : index
      %c0_35 = arith.constant 0 : index
      %65 = vector.load %arg8[%c0_34, %c0_35] : memref<4x4xf32, #tpu.memory_space<vmem>>, vector<4x4xf32>
      %cst_36 = arith.constant dense<0.000000e+00> : vector<4x128xf32>
      %66 = tpu.matmul %65, %64, %cst_36 {dimension_numbers = #tpu.dot_dimension_numbers<[1], [0], [0], [1], [0, 0, 1, 1], [], []>} : vector<4x4xf32>, vector<4x128xf32>, vector<4x128xf32> -> vector<4x128xf32>
      %c0_37 = arith.constant 0 : index
      %67 = arith.index_cast %1 : i32 to index
      %68 = vector.load %arg13[%c0_37, %67] : memref<4x256xf32, #tpu.memory_space<vmem>>, vector<4x128xf32>
      tpu.vector_store %arg13[%c0_37, %67], %66 {strides = array<i32>} : memref<4x256xf32, #tpu.memory_space<vmem>>, vector<4x128xf32>,
      %c0_38 = arith.constant 0 : index
      %c0_39 = arith.constant 0 : index
      %69 = vector.load %arg9[%c0_38, %c0_39] : memref<4x4xf32, #tpu.memory_space<vmem>>, vector<4x4xf32>
      %cst_40 = arith.constant dense<0.000000e+00> : vector<4x128xf32>
      %70 = tpu.matmul %69, %64, %cst_40 {dimension_numbers = #tpu.dot_dimension_numbers<[1], [0], [0], [1], [0, 0, 1, 1], [], []>} : vector<4x4xf32>, vector<4x128xf32>, vector<4x128xf32> -> vector<4x128xf32>
      %c0_41 = arith.constant 0 : index
      %71 = arith.index_cast %1 : i32 to index
      %72 = vector.load %arg14[%c0_41, %71] : memref<4x256xf32, #tpu.memory_space<vmem>>, vector<4x128xf32>
      tpu.vector_store %arg14[%c0_41, %71], %70 {strides = array<i32>} : memref<4x256xf32, #tpu.memory_space<vmem>>, vector<4x128xf32>,
    } else {
    }
    %c0_i32_4 = arith.constant 0 : i32
    %7 = arith.cmpi eq, %arg2, %c0_i32_4 : i32
    %8 = arith.extui %7 : i1 to i32
    %c0_i32_5 = arith.constant 0 : i32
    %9 = arith.cmpi ne, %8, %c0_i32_5 : i32
    scf.if %9 {
      %c0_26 = arith.constant 0 : index
      %c0_27 = arith.constant 0 : index
      %c0_28 = arith.constant 0 : index
      %41 = vector.load %arg3[%c0_26, %c0_27, %c0_28] : memref<1x4x128xf32, #tpu.memory_space<vmem>>, vector<1x4x128xf32>
      %42 = vector.shape_cast %41 : vector<1x4x128xf32> to vector<4x128xf32>
      %cst_29 = arith.constant dense<0.000000e+00> : vector<128xf32>
      %43 = vector.multi_reduction <add>, %42, %cst_29 [0] : vector<4x128xf32> to vector<128xf32>
      %44 = vector.shape_cast %43 : vector<128xf32> to vector<1x128xf32>
      %cst_30 = arith.constant 4.000000e+00 : f32
      %45 = vector.broadcast %cst_30 : f32 to vector<1x128xf32>
      %46 = arith.divf %44, %45 : vector<1x128xf32>
      %47 = vector.broadcast %46 : vector<1x128xf32> to vector<4x128xf32>
      %48 = arith.subf %42, %47 : vector<4x128xf32>
      %49 = arith.mulf %48, %48 : vector<4x128xf32>
      %cst_31 = arith.constant dense<0.000000e+00> : vector<128xf32>
      %50 = vector.multi_reduction <add>, %49, %cst_31 [0] : vector<4x128xf32> to vector<128xf32>
      %51 = vector.shape_cast %50 : vector<128xf32> to vector<1x128xf32>
      %cst_32 = arith.constant 4.000000e+00 : f32
      %52 = vector.broadcast %cst_32 : f32 to vector<1x128xf32>
      %53 = arith.divf %51, %52 : vector<1x128xf32>
      %54 = vector.broadcast %46 : vector<1x128xf32> to vector<4x128xf32>
      %55 = arith.subf %42, %54 : vector<4x128xf32>
      %cst_33 = arith.constant 9.99999974E-6 : f32
      %56 = vector.broadcast %cst_33 : f32 to vector<1x128xf32>
      %57 = arith.addf %53, %56 : vector<1x128xf32>
      %58 = math.rsqrt %57 : vector<1x128xf32>
      %59 = vector.broadcast %58 : vector<1x128xf32> to vector<4x128xf32>
      %60 = arith.mulf %55, %59 : vector<4x128xf32>
      %61 = vector.broadcast %2 : vector<4x1xf32> to vector<4x128xf32>
      %62 = arith.mulf %60, %61 : vector<4x128xf32>
      %63 = vector.broadcast %3 : vector<4x1xf32> to vector<4x128xf32>
      %64 = arith.addf %62, %63 : vector<4x128xf32>
      %c0_34 = arith.constant 0 : index
      %c0_35 = arith.constant 0 : index
      %65 = vector.load %arg7[%c0_34, %c0_35] : memref<4x4xf32, #tpu.memory_space<vmem>>, vector<4x4xf32>
      %cst_36 = arith.constant dense<0.000000e+00> : vector<4x128xf32>
      %66 = tpu.matmul %65, %64, %cst_36 {dimension_numbers = #tpu.dot_dimension_numbers<[1], [0], [0], [1], [0, 0, 1, 1], [], []>} : vector<4x4xf32>, vector<4x128xf32>, vector<4x128xf32> -> vector<4x128xf32>
      %c0_37 = arith.constant 0 : index
      %c0_38 = arith.constant 0 : index
      %67 = vector.load %arg12[%c0_37, %c0_38] : memref<4x128xf32, #tpu.memory_space<vmem>>, vector<4x128xf32>
      tpu.vector_store %arg12[%c0_37, %c0_38], %66 {strides = array<i32>} : memref<4x128xf32, #tpu.memory_space<vmem>>, vector<4x128xf32>,
      %cst_39 = arith.constant 0xFF800000 : f32
      %68 = vector.broadcast %cst_39 : f32 to vector<1x128xf32>
      %c0_40 = arith.constant 0 : index
      %c0_41 = arith.constant 0 : index
      %69 = vector.load %arg15[%c0_40, %c0_41] : memref<1x128xf32, #tpu.memory_space<vmem>>, vector<1x128xf32>
      tpu.vector_store %arg15[%c0_40, %c0_41], %68 {strides = array<i32>} : memref<1x128xf32, #tpu.memory_space<vmem>>, vector<1x128xf32>,
      %cst_42 = arith.constant 0.000000e+00 : f32
      %70 = vector.broadcast %cst_42 : f32 to vector<1x128xf32>
      %c0_43 = arith.constant 0 : index
      %c0_44 = arith.constant 0 : index
      %71 = vector.load %arg16[%c0_43, %c0_44] : memref<1x128xf32, #tpu.memory_space<vmem>>, vector<1x128xf32>
      tpu.vector_store %arg16[%c0_43, %c0_44], %70 {strides = array<i32>} : memref<1x128xf32, #tpu.memory_space<vmem>>, vector<1x128xf32>,
      %cst_45 = arith.constant 0.000000e+00 : f32
      %72 = vector.broadcast %cst_45 : f32 to vector<4x128xf32>
      %c0_46 = arith.constant 0 : index
      %c0_47 = arith.constant 0 : index
      %73 = vector.load %arg17[%c0_46, %c0_47] : memref<4x128xf32, #tpu.memory_space<vmem>>, vector<4x128xf32>
      tpu.vector_store %arg17[%c0_46, %c0_47], %72 {strides = array<i32>} : memref<4x128xf32, #tpu.memory_space<vmem>>, vector<4x128xf32>,
    } else {
    }
    %c0_6 = arith.constant 0 : index
    %10 = arith.index_cast %1 : i32 to index
    %11 = vector.load %arg13[%c0_6, %10] : memref<4x256xf32, #tpu.memory_space<vmem>>, vector<4x128xf32>
    %c0_7 = arith.constant 0 : index
    %12 = arith.index_cast %1 : i32 to index
    %13 = vector.load %arg14[%c0_7, %12] : memref<4x256xf32, #tpu.memory_space<vmem>>, vector<4x128xf32>
    %c0_8 = arith.constant 0 : index
    %c0_9 = arith.constant 0 : index
    %14 = vector.load %arg12[%c0_8, %c0_9] : memref<4x128xf32, #tpu.memory_space<vmem>>, vector<4x128xf32>
    %cst = arith.constant dense<0.000000e+00> : vector<128x128xf32>
    %15 = tpu.matmul %11, %14, %cst {dimension_numbers = #tpu.dot_dimension_numbers<[0], [0], [1], [1], [0, 1, 1, 1], [], []>} : vector<4x128xf32>, vector<4x128xf32>, vector<128x128xf32> -> vector<128x128xf32>
    %c0_10 = arith.constant 0 : index
    %c0_11 = arith.constant 0 : index
    %16 = vector.load %arg15[%c0_10, %c0_11] : memref<1x128xf32, #tpu.memory_space<vmem>>, vector<1x128xf32>
    %cst_12 = arith.constant dense<0xFF800000> : vector<128xf32>
    %17 = vector.multi_reduction <maximumf>, %15, %cst_12 [0] : vector<128x128xf32> to vector<128xf32>
    %18 = vector.shape_cast %17 : vector<128xf32> to vector<1x128xf32>
    %19 = arith.maximumf %16, %18 : vector<1x128xf32>
    %20 = arith.subf %16, %19 : vector<1x128xf32>
    %21 = math.exp %20 : vector<1x128xf32>
    %22 = vector.broadcast %19 : vector<1x128xf32> to vector<128x128xf32>
    %23 = arith.subf %15, %22 : vector<128x128xf32>
    %24 = math.exp %23 : vector<128x128xf32>
    %c0_13 = arith.constant 0 : index
    %c0_14 = arith.constant 0 : index
    %25 = vector.load %arg16[%c0_13, %c0_14] : memref<1x128xf32, #tpu.memory_space<vmem>>, vector<1x128xf32>
    %26 = arith.mulf %21, %25 : vector<1x128xf32>
    %cst_15 = arith.constant dense<0.000000e+00> : vector<128xf32>
    %27 = vector.multi_reduction <add>, %24, %cst_15 [0] : vector<128x128xf32> to vector<128xf32>
    %28 = vector.shape_cast %27 : vector<128xf32> to vector<1x128xf32>
    %29 = arith.addf %26, %28 : vector<1x128xf32>
    %c0_16 = arith.constant 0 : index
    %c0_17 = arith.constant 0 : index
    %30 = vector.load %arg16[%c0_16, %c0_17] : memref<1x128xf32, #tpu.memory_space<vmem>>, vector<1x128xf32>
    tpu.vector_store %arg16[%c0_16, %c0_17], %29 {strides = array<i32>} : memref<1x128xf32, #tpu.memory_space<vmem>>, vector<1x128xf32>,
    %c0_18 = arith.constant 0 : index
    %c0_19 = arith.constant 0 : index
    %31 = vector.load %arg17[%c0_18, %c0_19] : memref<4x128xf32, #tpu.memory_space<vmem>>, vector<4x128xf32>
    %32 = vector.broadcast %21 : vector<1x128xf32> to vector<4x128xf32>
    %33 = arith.mulf %32, %31 : vector<4x128xf32>
    %cst_20 = arith.constant dense<0.000000e+00> : vector<4x128xf32>
    %34 = tpu.matmul %13, %24, %cst_20 {dimension_numbers = #tpu.dot_dimension_numbers<[1], [0], [0], [1], [0, 0, 1, 1], [], []>} : vector<4x128xf32>, vector<128x128xf32>, vector<4x128xf32> -> vector<4x128xf32>
    %35 = arith.addf %33, %34 : vector<4x128xf32>
    %c0_21 = arith.constant 0 : index
    %c0_22 = arith.constant 0 : index
    %36 = vector.load %arg17[%c0_21, %c0_22] : memref<4x128xf32, #tpu.memory_space<vmem>>, vector<4x128xf32>
    tpu.vector_store %arg17[%c0_21, %c0_22], %35 {strides = array<i32>} : memref<4x128xf32, #tpu.memory_space<vmem>>, vector<4x128xf32>,
    %c0_23 = arith.constant 0 : index
    %c0_24 = arith.constant 0 : index
    %37 = vector.load %arg15[%c0_23, %c0_24] : memref<1x128xf32, #tpu.memory_space<vmem>>, vector<1x128xf32>
    tpu.vector_store %arg15[%c0_23, %c0_24], %19 {strides = array<i32>} : memref<1x128xf32, #tpu.memory_space<vmem>>, vector<1x128xf32>,
    %c1_i32 = arith.constant 1 : i32
    %38 = arith.cmpi eq, %arg2, %c1_i32 : i32
    %39 = arith.extui %38 : i1 to i32
    %c0_i32_25 = arith.constant 0 : i32
    %40 = arith.cmpi ne, %39, %c0_i32_25 : i32
    scf.if %40 {
      %c0_26 = arith.constant 0 : index
      %c0_27 = arith.constant 0 : index
      %41 = vector.load %arg16[%c0_26, %c0_27] : memref<1x128xf32, #tpu.memory_space<vmem>>, vector<1x128xf32>
      %cst_28 = arith.constant 1.000000e+00 : f32
      %42 = vector.broadcast %cst_28 : f32 to vector<1x128xf32>
      %43 = arith.divf %42, %41 : vector<1x128xf32>
      %c0_29 = arith.constant 0 : index
      %c0_30 = arith.constant 0 : index
      %44 = vector.load %arg17[%c0_29, %c0_30] : memref<4x128xf32, #tpu.memory_space<vmem>>, vector<4x128xf32>
      %45 = vector.broadcast %43 : vector<1x128xf32> to vector<4x128xf32>
      %46 = arith.mulf %44, %45 : vector<4x128xf32>
      %c0_31 = arith.constant 0 : index
      %c0_32 = arith.constant 0 : index
      %47 = vector.load %arg10[%c0_31, %c0_32] : memref<4x4xf32, #tpu.memory_space<vmem>>, vector<4x4xf32>
      %cst_33 = arith.constant dense<0.000000e+00> : vector<4x128xf32>
      %48 = tpu.matmul %47, %46, %cst_33 {dimension_numbers = #tpu.dot_dimension_numbers<[1], [0], [0], [1], [0, 0, 1, 1], [], []>} : vector<4x4xf32>, vector<4x128xf32>, vector<4x128xf32> -> vector<4x128xf32>
      %c0_34 = arith.constant 0 : index
      %c0_35 = arith.constant 0 : index
      %c0_36 = arith.constant 0 : index
      %49 = vector.load %arg3[%c0_34, %c0_35, %c0_36] : memref<1x4x128xf32, #tpu.memory_space<vmem>>, vector<1x4x128xf32>
      %50 = vector.shape_cast %49 : vector<1x4x128xf32> to vector<4x128xf32>
      %51 = arith.addf %48, %50 : vector<4x128xf32>
      %c0_37 = arith.constant 0 : index
      %c0_38 = arith.constant 0 : index
      %c0_39 = arith.constant 0 : index
      %52 = vector.load %arg11[%c0_37, %c0_38, %c0_39] : memref<1x4x128xf32, #tpu.memory_space<vmem>>, vector<1x4x128xf32>
      %53 = vector.shape_cast %52 : vector<1x4x128xf32> to vector<4x128xf32>
      %54 = vector.shape_cast %51 : vector<4x128xf32> to vector<1x4x128xf32>
      tpu.vector_store %arg11[%c0_37, %c0_38, %c0_39], %54 {strides = array<i32>} : memref<1x4x128xf32, #tpu.memory_space<vmem>>, vector<1x4x128xf32>,
    } else {
    }
    return
  }
  func.func @transform_0(%arg0: i32, %arg1: i32, %arg2: i32) -> (i32, i32, i32) {
    %c0_i32 = arith.constant 0 : i32
    %c0_i32_0 = arith.constant 0 : i32
    return %arg0, %c0_i32, %arg1 : i32, i32, i32
  }
  func.func @transform_1(%arg0: i32, %arg1: i32, %arg2: i32) -> (i32, i32, i32) {
    %c0_i32 = arith.constant 0 : i32
    %0 = arith.cmpi eq, %arg1, %c0_i32 : i32
    %c0_i32_0 = arith.constant 0 : i32
    %1 = arith.select %0, %arg2, %c0_i32_0 : i32
    %c0_i32_1 = arith.constant 0 : i32
    %c0_i32_2 = arith.constant 0 : i32
    return %arg0, %c0_i32_1, %1 : i32, i32, i32
  }
  func.func @transform_2(%arg0: i32, %arg1: i32, %arg2: i32) -> (i32, i32) {
    %c0_i32 = arith.constant 0 : i32
    %c0_i32_0 = arith.constant 0 : i32
    %c0_i32_1 = arith.constant 0 : i32
    return %c0_i32, %c0_i32_0 : i32, i32
  }
  func.func @transform_3(%arg0: i32, %arg1: i32, %arg2: i32) -> (i32, i32) {
    %c0_i32 = arith.constant 0 : i32
    %c0_i32_0 = arith.constant 0 : i32
    %c0_i32_1 = arith.constant 0 : i32
    return %c0_i32, %c0_i32_0 : i32, i32
  }
  func.func @transform_4(%arg0: i32, %arg1: i32, %arg2: i32) -> (i32, i32) {
    %c0_i32 = arith.constant 0 : i32
    %c0_i32_0 = arith.constant 0 : i32
    %c0_i32_1 = arith.constant 0 : i32
    return %c0_i32, %c0_i32_0 : i32, i32
  }
  func.func @transform_5(%arg0: i32, %arg1: i32, %arg2: i32) -> (i32, i32) {
    %c0_i32 = arith.constant 0 : i32
    %c0_i32_0 = arith.constant 0 : i32
    %c0_i32_1 = arith.constant 0 : i32
    return %c0_i32, %c0_i32_0 : i32, i32
  }
  func.func @transform_6(%arg0: i32, %arg1: i32, %arg2: i32) -> (i32, i32) {
    %c0_i32 = arith.constant 0 : i32
    %c0_i32_0 = arith.constant 0 : i32
    %c0_i32_1 = arith.constant 0 : i32
    return %c0_i32, %c0_i32_0 : i32, i32
  }
  func.func @transform_7(%arg0: i32, %arg1: i32, %arg2: i32) -> (i32, i32) {
    %c0_i32 = arith.constant 0 : i32
    %c0_i32_0 = arith.constant 0 : i32
    %c0_i32_1 = arith.constant 0 : i32
    return %c0_i32, %c0_i32_0 : i32, i32
  }
  func.func @transform_8(%arg0: i32, %arg1: i32, %arg2: i32) -> (i32, i32, i32) {
    %c0_i32 = arith.constant 0 : i32
    %c0_i32_0 = arith.constant 0 : i32
    return %arg0, %c0_i32, %arg1 : i32, i32, i32
  }
}

</mosaic_0001>

<bundles_post_ra>
// kernel: tpu_custom_call.1
= control target key start
LH: loop header
LB: loop body
LE: loop exit
PB: predicated region body
PF: predicated region fallthrough
CT: control target
= control target key end

     0   :  { %s3009_s0 = inlined_call_operand.hbm [shape: f32[2,4,256], index: 0, kind: input, shape index: {}]   ;;  %s3010_s1 = inlined_call_operand.hbm [shape: f32[2,4,256], index: 1, kind: input, shape index: {}]   ;;  %s3011_s2 = inlined_call_operand.hbm [shape: f32[4,1], index: 2, kind: input, shape index: {}]   ;;  %s3012_s3 = inlined_call_operand.hbm [shape: f32[4,1], index: 3, kind: input, shape index: {}]   ;;  %s3013_s4 = inlined_call_operand.hbm [shape: f32[4,4], index: 4, kind: input, shape index: {}]   ;;  %s3014_s5 = inlined_call_operand.hbm [shape: f32[4,4], index: 5, kind: input, shape index: {}]   ;;  %s3015_s6 = inlined_call_operand.hbm [shape: f32[4,4], index: 6, kind: input, shape index: {}]   ;;  %s3016_s7 = inlined_call_operand.hbm [shape: f32[4,4], index: 7, kind: input, shape index: {}]   ;;  %s3017_s8 = inlined_call_operand.hbm [shape: f32[2,4,256], index: 8, kind: output, shape index: {}]  }
   0x1   :  { %3030 = sst [smem:[#allocation37_spill]] %s3010_s1 }
   0x2   :  { %3031 = sst [smem:[#allocation38_spill]] %s3011_s2 }
   0x3   :  { %3032 = sst [smem:[#allocation39_spill]] %s3012_s3 }
   0x4   :  { %3033 = sst [smem:[#allocation40_spill]] %s3013_s4 }
   0x5   :  { %3034 = sst [smem:[#allocation41_spill]] %s3014_s5 }
   0x6   :  { %3035 = sst [smem:[#allocation42_spill]] %s3015_s6 }
   0x7   :  { %3036 = sst [smem:[#allocation43_spill]] %s3016_s7 }
   0x8   :  { %3037 = sst [smem:[#allocation44_spill]] %s3017_s8 }
   0x9   :  { %13 = vsyncpa [#allocation9], 0 }
   0xa   :  { %15 = vsyncpa [#allocation9 + $0x1], 0 }
   0xb   :  { %16 = vsyncpa [#allocation12], 0 }
   0xc   :  { %18 = vsyncpa [#allocation12 + $0x1], 0 }
   0xd   :  { %19 = vsyncpa [#allocation15], 0 }
   0xe   :  { %20 = vsyncpa [#allocation18], 0 }
   0xf   :  { %21 = vsyncpa [#allocation21], 0 }
  0x10   :  { %22 = vsyncpa [#allocation10], 0 }
  0x11   :  { %24 = vsyncpa [#allocation10 + $0x1], 0  ;;  %s2414_s27 = smov 0   ;;  %s2416_s28 = smov 0  }
  0x12   :  { %s2418_s29 = smov 0   ;;  %s2420_s30 = smov 0  }
  0x13   :  { %s2422_s9 = smov 0   ;;  %s2424_s10 = smov 0  }
  0x14   :  { %s2426_s11 = smov 0   ;;  %s2428_s12 = smov 0  }
  0x15   :  { %s2430_s13 = smov 0   ;;  %s2432_s14 = smov 0  }
  0x16   :  { %s2434_s15 = smov 0   ;;  %s2436_s16 = smov 0  }
  0x17   :  { %s2438_s17 = smov 0  }
  0x18 LB: > { %3038 = sst [smem:[#allocation30_spill]] %s2298_s27  ;;  %s2480_s18 = sadd.s32 4294967295, %s2346_s17   ;;  %s2346_s17 = sphi %s2438_s17, %s30_s17   ;;  %s2342_s16 = sphi %s2436_s16, %s3104_s16   ;;  %s2338_s15 = sphi %s2434_s15, %s3103_s15   ;;  %s2334_s14 = sphi %s2432_s14, %s3102_s14   ;;  %s2330_s13 = sphi %s2430_s13, %s3101_s13   ;;  %s2326_s12 = sphi %s2428_s12, %s3100_s12   ;;  %s2322_s11 = sphi %s2426_s11, %s3099_s11   ;;  %s2318_s10 = sphi %s2424_s10, %s3098_s10   ;;  %s2314_s9 = sphi %s2422_s9, %s3097_s9   ;;  %s2310_s30 = sphi %s2420_s30, %s3096_s30   ;;  %s2306_s29 = sphi %s2418_s29, %s3095_s29   ;;  %s2302_s28 = sphi %s2416_s28, %s3094_s28   ;;  %s2298_s27 = sphi %s2414_s27, %s3093_s27  }
  0x19   : > { %3039 = sst [smem:[#allocation31_spill]] %s2322_s11  ;;  %p1513_p0 = scmp.ge.s32.totalorder %s2346_s17, 1 }
  0x1a   : > { %3040 = sst [smem:[#allocation32_spill]] %s2326_s12  ;;  %p3021_p1 = scmp.eq.s32.totalorder %s2480_s18, 0 }
  0x1b   : > { %3041 = sst [smem:[#allocation33_spill]] %s2330_s13  ;;  %p268_p2 = scmp.lt.s32.totalorder %s2346_s17, 9 }
  0x1c   : > { %s2348_s20 = smov [#allocation13]   ;;  %s2349_s22 = smov [#allocation14]  }
  0x1d   : > { %p2485_p3 = pnand %p1513_p0, %p268_p2  ;;  %s281_s21 = sshll.u32 %s2348_s20, 4  ;;  %s282_s21 = int_to_ptr.vmem [resolvable:$true] %s281_s21 }
  0x1e   : > { %s292_s23 = sshll.u32 %s2349_s22, 4  ;;  %s2350_s25 = smov [#allocation17]   ;;  %s2497_s23 = int_to_ptr.vmem [resolvable:$true] %s292_s23 }
  0x1f   : > { %s3042_s19 = scalar_select %p2485_p3, 1, 0 }
  0x20   : > { %p1752_p4 = pneg %p2485_p3  ;;  %s314_s26 = sshll.u32 %s2350_s25, 4  ;;  %s2499_s26 = int_to_ptr.vmem [resolvable:$true] %s314_s26 }
  0x21   : > { %3043 = sst [smem:[#allocation34_spill]] %s3042_s19  ;;  %s3045_s2 = sld [smem:[#allocation38_spill]] }
  0x22   : > { %p2493_p5 = pnand %p1752_p4, %p3021_p1 }
  0x24   : > { %p2509_p7 = pneg %p2493_p5 }
  0x27   : > { %s1960_s20 = scalar_lea.hbm %s3045_s2, 64 }
  0x28   : > { %p1961_p6 = scmp.ne.s32.totalorder %s3045_s2, %s1960_s20  ;;  %p1967_p10 = scmp.lt.u32.totalorder %s1960_s20, %s3045_s2 }
  0x2a   : > { %p1963_p8 = pnand %p2509_p7, %p1961_p6 }
  0x2c   : > { %p1964_p9 = pneg %p1963_p8 }
  0x2e   : > { %p1969_p11 = pnand %p1967_p10, %p1964_p9 }
  0x30   : > { %1972 = shalt.err (!%p1969_p11)
}
  0x31   : > { %s1973_s8 = scalar_lea.vmem %s282_s21, 64  ;;  %p1981_p2 = scmp.lt.s32.totalorder %s282_s21, %s282_s21 }
  0x32   : > { %p1974_p12 = scmp.ne.s32.totalorder %s282_s21, %s1973_s8  ;;  %p1982_p4 = scmp.lt.s32.totalorder %s1973_s8, %s1973_s8 }
  0x34   : > { %p1976_p13 = pnand %p1974_p12, %p2509_p7  ;;  %p1983_p1 = por %p1982_p4, %p1981_p2 }
  0x36   : > { %p1977_p0 = pneg %p1976_p13 }
  0x38   : > { %p1984_p3 = pnand %p1983_p1, %p1977_p0 }
  0x3a   : > { %1987 = shalt.err (!%p1984_p3)
}
  0x3b   : > { %1755 = dma.hbm_to_vmem [thread:$0]  (!%p2493_p5), %s3045_s2, 64, %s282_s21, [#allocation12]  }
  0x3c   : > { %s3047_s3 = sld [smem:[#allocation39_spill]] }
  0x42   : > { %s1988_s20 = scalar_lea.hbm %s3047_s3, 64 }
  0x43   : > { %p1989_p6 = scmp.ne.s32.totalorder %s3047_s3, %s1988_s20  ;;  %p1995_p1 = scmp.lt.u32.totalorder %s1988_s20, %s3047_s3 }
  0x45   : > { %p1991_p8 = pnand %p1989_p6, %p2509_p7 }
  0x47   : > { %p1992_p9 = pneg %p1991_p8 }
  0x49   : > { %p1997_p3 = pnand %p1995_p1, %p1992_p9 }
  0x4b   : > { %2000 = shalt.err (!%p1997_p3)
}
  0x4c   : > { %s2001_s21 = scalar_lea.vmem %s2497_s23, 64  ;;  %p2009_p13 = scmp.lt.s32.totalorder %s2497_s23, %s2497_s23 }
  0x4d   : > { %p2002_p10 = scmp.ne.s32.totalorder %s2497_s23, %s2001_s21  ;;  %p2010_p0 = scmp.lt.s32.totalorder %s2001_s21, %s2001_s21 }
  0x4f   : > { %p2004_p11 = pnand %p2002_p10, %p2509_p7  ;;  %p2011_p2 = por %p2010_p0, %p2009_p13 }
  0x51   : > { %p2005_p12 = pneg %p2004_p11 }
  0x53   : > { %p2012_p4 = pnand %p2011_p2, %p2005_p12 }
  0x55   : > { %2015 = shalt.err (!%p2012_p4)
}
  0x56   : > { %1758 = dma.hbm_to_vmem [thread:$0]  (!%p2493_p5), %s3047_s3, 64, %s2497_s23, [#allocation15]  }
  0x57   : > { %s3048_s5 = sld [smem:[#allocation41_spill]] }
  0x5d   : > { %s2016_s13 = scalar_lea.hbm %s3048_s5, 64 }
  0x5e   : > { %p2017_p6 = scmp.ne.s32.totalorder %s3048_s5, %s2016_s13  ;;  %p2023_p1 = scmp.lt.u32.totalorder %s2016_s13, %s3048_s5 }
  0x60   : > { %p2019_p8 = pnand %p2017_p6, %p2509_p7 }
  0x62   : > { %p2020_p9 = pneg %p2019_p8 }
  0x64   : > { %p2025_p3 = pnand %p2023_p1, %p2020_p9 }
  0x66   : > { %2028 = shalt.err (!%p2025_p3)
}
  0x67   : > { %s2029_s23 = scalar_lea.vmem %s2499_s26, 64  ;;  %p2037_p13 = scmp.lt.s32.totalorder %s2499_s26, %s2499_s26 }
  0x68   : > { %p2030_p10 = scmp.ne.s32.totalorder %s2499_s26, %s2029_s23  ;;  %p2038_p0 = scmp.lt.s32.totalorder %s2029_s23, %s2029_s23 }
  0x6a   : > { %p2032_p11 = pnand %p2030_p10, %p2509_p7  ;;  %p2039_p2 = por %p2038_p0, %p2037_p13 }
  0x6c   : > { %p2033_p12 = pneg %p2032_p11 }
  0x6e   : > { %p2040_p4 = pnand %p2039_p2, %p2033_p12 }
  0x70   : > { %2043 = shalt.err (!%p2040_p4)
}
  0x71   : > { %1764 = dma.hbm_to_vmem [thread:$0]  (!%p2493_p5), %s3048_s5, 64, %s2499_s26, [#allocation18]  }
  0x72   : > { %s2351_s27 = smov [#allocation16]   ;;  %s2352_s12 = smov [#allocation19]  }
  0x73   : > { %s303_s11 = sshll.u32 %s2351_s27, 4  ;;  %s325_s13 = sshll.u32 %s2352_s12, 4  ;;  %s304_s11 = int_to_ptr.vmem [resolvable:$true] %s303_s11  ;;  %s326_s13 = int_to_ptr.vmem [resolvable:$true] %s325_s13 }
  0x74   : > { %s3049_s4 = sld [smem:[#allocation40_spill]] }
  0x7a   : > { %s2044_s25 = scalar_lea.hbm %s3049_s4, 64 }
  0x7b   : > { %p2045_p6 = scmp.ne.s32.totalorder %s3049_s4, %s2044_s25  ;;  %p2051_p1 = scmp.lt.u32.totalorder %s2044_s25, %s3049_s4 }
  0x7d   : > { %p2047_p8 = pnand %p2045_p6, %p2509_p7 }
  0x7f   : > { %p2048_p9 = pneg %p2047_p8 }
  0x81   : > { %p2053_p3 = pnand %p2051_p1, %p2048_p9 }
  0x83   : > { %2056 = shalt.err (!%p2053_p3)
}
  0x84   : > { %s2057_s26 = scalar_lea.vmem %s304_s11, 64  ;;  %p2065_p13 = scmp.lt.s32.totalorder %s304_s11, %s304_s11 }
  0x85   : > { %p2058_p10 = scmp.ne.s32.totalorder %s304_s11, %s2057_s26  ;;  %p2066_p0 = scmp.lt.s32.totalorder %s2057_s26, %s2057_s26 }
  0x87   : > { %p2060_p11 = pnand %p2058_p10, %p2509_p7  ;;  %p2067_p2 = por %p2066_p0, %p2065_p13 }
  0x89   : > { %p2061_p12 = pneg %p2060_p11 }
  0x8b   : > { %p2068_p4 = pnand %p2067_p2, %p2061_p12 }
  0x8d   : > { %2071 = shalt.err (!%p2068_p4)
}
  0x8e   : > { %1761 = dma.hbm_to_vmem [thread:$0]  (!%p2493_p5), %s3049_s4, 64, %s304_s11, [#allocation15]  }
  0x8f   : > { %s3050_s6 = sld [smem:[#allocation42_spill]] }
  0x95   : > { %s2072_s19 = scalar_lea.hbm %s3050_s6, 64 }
  0x96   : > { %p2073_p6 = scmp.ne.s32.totalorder %s3050_s6, %s2072_s19  ;;  %p2079_p1 = scmp.lt.u32.totalorder %s2072_s19, %s3050_s6 }
  0x98   : > { %p2075_p8 = pnand %p2073_p6, %p2509_p7 }
  0x9a   : > { %p2076_p9 = pneg %p2075_p8 }
  0x9c   : > { %p2081_p3 = pnand %p2079_p1, %p2076_p9 }
  0x9e   : > { %2084 = shalt.err (!%p2081_p3)
}
  0x9f   : > { %s2085_s21 = scalar_lea.vmem %s326_s13, 64  ;;  %p2093_p13 = scmp.lt.s32.totalorder %s326_s13, %s326_s13 }
  0xa0   : > { %p2086_p10 = scmp.ne.s32.totalorder %s326_s13, %s2085_s21  ;;  %p2094_p0 = scmp.lt.s32.totalorder %s2085_s21, %s2085_s21 }
  0xa2   : > { %p2088_p11 = pnand %p2086_p10, %p2509_p7  ;;  %p2095_p2 = por %p2094_p0, %p2093_p13 }
  0xa4   : > { %p2089_p12 = pneg %p2088_p11 }
  0xa6   : > { %p2096_p4 = pnand %p2095_p2, %p2089_p12 }
  0xa8   : > { %2099 = shalt.err (!%p2096_p4)
}
  0xa9   : > { %1767 = dma.hbm_to_vmem [thread:$0]  (!%p2493_p5), %s3050_s6, 64, %s326_s13, [#allocation18]  }
  0xaa   : > { %s2353_s1 = smov [#allocation20]   ;;  %s3051_s7 = sld [smem:[#allocation43_spill]] }
  0xab   : > { %s336_s27 = sshll.u32 %s2353_s1, 4  ;;  %s337_s27 = int_to_ptr.vmem [resolvable:$true] %s336_s27 }
  0xb0   : > { %s2100_s19 = scalar_lea.hbm %s3051_s7, 64 }
  0xb1   : > { %p2101_p6 = scmp.ne.s32.totalorder %s3051_s7, %s2100_s19  ;;  %p2107_p1 = scmp.lt.u32.totalorder %s2100_s19, %s3051_s7 }
  0xb3   : > { %p2103_p8 = pnand %p2101_p6, %p2509_p7 }
  0xb5   : > { %p2104_p9 = pneg %p2103_p8 }
  0xb7   : > { %p2109_p3 = pnand %p2107_p1, %p2104_p9 }
  0xb9   : > { %2112 = shalt.err (!%p2109_p3)
}
  0xba   : > { %s2113_s13 = scalar_lea.vmem %s337_s27, 64  ;;  %p2121_p13 = scmp.lt.s32.totalorder %s337_s27, %s337_s27 }
  0xbb   : > { %p2114_p10 = scmp.ne.s32.totalorder %s337_s27, %s2113_s13  ;;  %p2122_p0 = scmp.lt.s32.totalorder %s2113_s13, %s2113_s13 }
  0xbd   : > { %p2116_p11 = pnand %p2114_p10, %p2509_p7  ;;  %p2123_p2 = por %p2122_p0, %p2121_p13 }
  0xbf   : > { %p2117_p12 = pneg %p2116_p11 }
  0xc1   : > { %p2124_p4 = pnand %p2123_p2, %p2117_p12 }
  0xc3   : > { %2127 = shalt.err (!%p2124_p4)
}
  0xc4   : > { %1770 = dma.hbm_to_vmem [thread:$0]  (!%p2493_p5), %s3051_s7, 64, %s337_s27, [#allocation21]  }
  0xc5   : > { %s42_s22 = sadd.s32 1, %s2334_s14  ;;  %s45_s26 = sadd.s32 1, %s2338_s15 }
  0xc6   : > { %p43_p7 = scmp.ge.s32.totalorder %s42_s22, 2  ;;  %s49_s1 = sadd.s32 1, %s2342_s16 }
  0xc7   : > { %s58_s2 = sadd.s32 1, %s2318_s10  ;;  %p65_p6 = scmp.ne.s32.totalorder %s2318_s10, %s2314_s9 }
  0xc8   : > { %s3106_s22 = smov (%p43_p7, %s42_s22), 0  ;;  %s3108_s26 = smov (!%p43_p7, %s45_s26), %s2338_s15 }
  0xc9   : > { %p3027_p5 = scmp.eq.s32.totalorder %s2346_s17, 0  ;;  %p47_p8 = scmp.ge.s32.totalorder %s3108_s26, 2 }
  0xca   : > { %p71_p9 = scmp.ne.s32.totalorder %s2314_s9, %s2310_s30  ;;  %p81_p3 = scmp.eq.s32.totalorder %s2338_s15, 0 }
  0xcb   : > { %p2643_p1 = por %p3027_p5, %p65_p6  ;;  %s3110_s26 = smov (%p47_p8, %s3108_s26), 0 }
  0xcc   : > { %3053 = sst [smem:[#allocation35_spill]] %s3110_s26  ;;  %s3112_s1 = smov (!%p47_p8, %s49_s1), %s2342_s16 }
  0xcd   : > { %s54_s12 = ssub.s32 %s2338_s15, %s3110_s26  ;;  %p3054_p10 = scmp.eq.s32.totalorder %s2480_s18, 0 }
  0xce   : > { %p51_p12 = scmp.ge.s32.totalorder %s3112_s1, 2  ;;  %p83_p13 = scmp.eq.s32.totalorder %s3110_s26, 0 }
  0xcf   : > { %p2658_p11 = por %p3054_p10, %p71_p9  ;;  %p255_p0 = scmp.eq.s32.totalorder %s2480_s18, 7 }
  0xd0   : > { %s82_s20 = scalar_select %p81_p3, %s2334_s14, 0 }
  0xd1   : > { %s3114_s1 = smov (%p51_p12, %s3112_s1), 0  ;;  %p2676_p7 = por %p255_p0, %p65_p6 }
  0xd2   : > { %3056 = sst [smem:[#allocation36_spill]] %s3114_s1  ;;  %s53_s8 = ssub.s32 %s2342_s16, %s3114_s1 }
  0xd3   : > { %s84_s25 = scalar_select %p83_p13, %s3106_s22, 0 }
  0xd4   : > { %s55_s23 = sor.u32 %s54_s12, %s53_s8  ;;  %s3058_s3 = sadd.s32 4294967294, %s2346_s17  }
  0xd5   : > { %s86_s13 = ssub.s32 %s82_s20, %s84_s25  ;;  %p56_p2 = scmp.eq.s32.totalorder %s55_s23, 0 }
  0xd6   : > { %s2670_s21 = sor.u32 %s86_s13, %s53_s8  ;;  %p261_p8 = scmp.eq.s32.totalorder %s3058_s3, 7 }
  0xd7   : > { %s3057_s11 = scalar_select %p2676_p7, 1, 0 }
  0xd8   : > { %s2681_s24 = scalar_select %p56_p2, %s2318_s10, %s58_s2  }
  0xd9   : > { %p3026_p3 = scmp.lt.s32.totalorder %s2346_s17, 8  ;;  %s347_s4 = sand.u32 1, %s2318_s10  }
  0xda   : > { %s1522_s12 = sshll.u32 %s2342_s16, 1  ;;  %p2691_p10 = por %p261_p8, %p71_p9 }
  0xdb   : > { %s1521_s8 = sshll.u32 %s347_s4, 2  ;;  %s356_s23 = sadd.s32 %s2338_s15, %s1522_s12 }
  0xdc   : > { %s3059_s25 = scalar_select %p2691_p10, 1, 0 }
  0xdd   : > { %s1523_s13 = sshll.u32 %s356_s23, 6  ;;  %s351_s3 = scalar_lea.vmem [#allocation8], %s1521_s8 }
  0xde   : > { %s2699_s7 = scalar_lea.hbm %s3009_s0, %s1523_s13  ;;  %s360_s2 = sshll.u32 %s351_s3, 4  ;;  %s2701_s2 = int_to_ptr.vmem [resolvable:$true] %s360_s2 }
  0xdf   : > { %p2707_p6 = pnand %p3026_p3, %p2643_p1  ;;  %s2711_s23 = sadd.s32 %s1522_s12, %s82_s20 }
  0xe0   : > { %s348_s5 = scalar_lea.sflag [#allocation9], %s347_s4  ;;  %s2128_s6 = scalar_lea.hbm %s2699_s7, 64 }
  0xe1   : > { %p2129_p9 = scmp.ne.s32.totalorder %s2699_s7, %s2128_s6  ;;  %p2130_p12 = pneg %p2707_p6 }
  0xe2   : > { %s2133_s13 = scalar_lea.hbm %s3009_s0, 256  ;;  %p2134_p1 = scmp.lt.u32.totalorder %s2699_s7, %s3009_s0 }
  0xe3   : > { %p2131_p13 = pnand %p2130_p12, %p2129_p9  ;;  %p2135_p2 = scmp.lt.u32.totalorder %s2133_s13, %s2128_s6 }
  0xe4   : > { %p2137_p3 = scmp.lt.u32.totalorder %s2128_s6, %s2699_s7 }
  0xe5   : > { %p2132_p0 = pneg %p2131_p13  ;;  %p2136_p8 = por %p2135_p2, %p2134_p1 }
  0xe7   : > { %p2138_p5 = por %p2137_p3, %p2136_p8 }
  0xe9   : > { %p2139_p4 = pnand %p2138_p5, %p2132_p0 }
  0xeb   : > { %2142 = shalt.err (!%p2139_p4)
}
  0xec   : > { %s2143_s4 = scalar_lea.vmem %s2701_s2, 64  ;;  %s2354_s20 = smov [#allocation8]  }
  0xed   : > { %p2144_p9 = scmp.ne.s32.totalorder %s2701_s2, %s2143_s4  ;;  %s2148_s12 = sshll.u32 %s2354_s20, 4  ;;  %s2149_s12 = int_to_ptr.vmem [resolvable:$false] %s2148_s12 }
  0xee   : > { %s2150_s26 = scalar_lea.vmem %s2149_s12, 128  ;;  %p2151_p7 = scmp.lt.s32.totalorder %s2701_s2, %s2149_s12 }
  0xef   : > { %p2146_p13 = pnand %p2144_p9, %p2130_p12  ;;  %p2152_p1 = scmp.lt.s32.totalorder %s2150_s26, %s2143_s4 }
  0xf1   : > { %p2147_p10 = pneg %p2146_p13  ;;  %p2153_p2 = por %p2152_p1, %p2151_p7 }
  0xf3   : > { %p2154_p3 = pnand %p2153_p2, %p2147_p10 }
  0xf5   : > { %2157 = shalt.err (!%p2154_p3)
}
  0xf6   : > { %s3061_s6 = sld [smem:[#allocation30_spill]]  ;;  %s90_s8 = sadd.s32 1, %s2306_s29 }
  0xf7   : > { %1774 = dma.hbm_to_vmem [thread:$0]  (!%p2707_p6), %s2699_s7, 64, %s2701_s2, %s348_s5  }
  0xf8   : > { %p97_p5 = scmp.ne.s32.totalorder %s2306_s29, %s2302_s28  ;;  %p3062_p4 = scmp.eq.s32.totalorder %s2670_s21, 0 }
  0xf9   : > { %p3063_p7 = scmp.eq.s32.totalorder %s2346_s17, 0  ;;  %s367_s27 = sand.u32 1, %s2346_s17  }
  0xfa   : > { %s2744_s1 = scalar_select %p3062_p4, %s2306_s29, %s90_s8  }
  0xfb   : > { %p99_p10 = por %p97_p5, %p3063_p7  ;;  %s369_s13 = sand.u32 1, %s2306_s29  }
  0xfc   : > { %p103_p12 = scmp.ne.s32.totalorder %s2302_s28, %s3061_s6  ;;  %p3064_p0 = scmp.eq.s32.totalorder %s2480_s18, 0 }
  0xfd   : > { %s1524_s4 = sshll.u32 %s369_s13, 2  ;;  %s1526_s20 = sshll.u32 %s2711_s23, 6 }
  0xfe   : > { %p2754_p8 = por %p103_p12, %p3064_p0  ;;  %s3066_s7 = sld [smem:[#allocation37_spill]] }
  0xff   : > { %s371_s21 = scalar_lea.vmem [#allocation11], %s1524_s4  ;;  %p3067_p6 = scmp.lt.s32.totalorder %s2346_s17, 8 }
 0x100   : > { %s3065_s3 = scalar_select %p2754_p8, 1, 0 }
 0x101   : > { %s382_s5 = sshll.u32 %s371_s21, 4  ;;  %p2766_p9 = pnand %p3067_p6, %p99_p10  ;;  %s2770_s5 = int_to_ptr.vmem [resolvable:$true] %s382_s5 }
 0x102   : > { %s368_s23 = scalar_lea.sflag [#allocation12], %s367_s27 }
 0x103   : > { %p2160_p1 = pneg %p2766_p9 }
 0x104   : > { %s2762_s2 = scalar_lea.hbm %s3066_s7, %s1526_s20  ;;  %s2163_s20 = scalar_lea.hbm %s3066_s7, 256 }
 0x105   : > { %s2158_s8 = scalar_lea.hbm %s2762_s2, 64  ;;  %p2164_p5 = scmp.lt.u32.totalorder %s2762_s2, %s3066_s7 }
 0x106   : > { %p2159_p13 = scmp.ne.s32.totalorder %s2762_s2, %s2158_s8  ;;  %p2165_p4 = scmp.lt.u32.totalorder %s2163_s20, %s2158_s8 }
 0x107   : > { %p2167_p10 = scmp.lt.u32.totalorder %s2158_s8, %s2762_s2 }
 0x108   : > { %p2161_p2 = pnand %p2160_p1, %p2159_p13  ;;  %p2166_p7 = por %p2165_p4, %p2164_p5 }
 0x10a   : > { %p2162_p3 = pneg %p2161_p2  ;;  %p2168_p12 = por %p2167_p10, %p2166_p7 }
 0x10c   : > { %p2169_p0 = pnand %p2168_p12, %p2162_p3 }
 0x10e   : > { %2172 = shalt.err (!%p2169_p0)
}
 0x10f   : > { %s2173_s27 = scalar_lea.vmem %s2770_s5, 64  ;;  %s2355_s21 = smov [#allocation11]  }
 0x110   : > { %p2174_p6 = scmp.ne.s32.totalorder %s2770_s5, %s2173_s27  ;;  %s2178_s13 = sshll.u32 %s2355_s21, 4  ;;  %s2179_s13 = int_to_ptr.vmem [resolvable:$false] %s2178_s13 }
 0x111   : > { %s2180_s4 = scalar_lea.vmem %s2179_s13, 128  ;;  %p2181_p8 = scmp.lt.s32.totalorder %s2770_s5, %s2179_s13 }
 0x112   : > { %p2176_p13 = pnand %p2174_p6, %p2160_p1  ;;  %p2182_p5 = scmp.lt.s32.totalorder %s2180_s4, %s2173_s27 }
 0x114   : > { %p2177_p2 = pneg %p2176_p13  ;;  %p2183_p4 = por %p2182_p5, %p2181_p8 }
 0x116   : > { %p2184_p7 = pnand %p2183_p4, %p2177_p2 }
 0x118   : > { %2187 = shalt.err (!%p2184_p7)
}
 0x119   : > { %1777 = dma.hbm_to_vmem [thread:$0]  (!%p2766_p9), %s2762_s2, 64, %s2770_s5, %s368_s23  }
 0x11a   : > { %s3069_s8 = sld [smem:[#allocation34_spill]] }
 0x120   : > { %p3070_p3 = scmp.ne.s32.totalorder %s3069_s8, 0 }
 0x121   : > { %s2800_s20 = sand.u32 (!%p3070_p3), 1, %s2314_s9  }
 0x122   : > { %391 = sbr.rel (%p3070_p3) target bundleno = 1979 (0x7bb), region = 52  ;;  %s1528_s12 = sshll.u32 (!%p3070_p3), %s2800_s20, 2 }
 0x123   : > { %s394_s26 = scalar_lea.sflag (!%p3070_p3), [#allocation9], %s2800_s20  ;;  %s2804_s27 = scalar_lea.vmem (!%p3070_p3), [#allocation8], %s1528_s12 }
 0x129   : > { %2269 = dma.done.wait (%p2658_p11), %s394_s26, 64  }
 0x12a   : > { %2271 = vsyncadd (%p2658_p11), %s394_s26, 4294967232  ;;  %s402_s2 = sand.u32 1, %s2480_s18   ;;  %s404_s5 = sand.u32 1, %s2302_s28  }
 0x12b   : > { %s2812_s6 = sshll.u32 %s404_s5, 2  ;;  %s403_s23 = scalar_lea.sflag [#allocation12], %s402_s2 }
 0x12c   : > { %s406_s21 = scalar_lea.vmem [#allocation11], %s2812_s6  ;;  %p3071_p8 = scmp.ne.s32.totalorder %s3065_s3, 0 }
 0x12e   : > { %2273 = dma.done.wait (%p3071_p8), %s403_s23, 64  }
 0x12f   : > { %2275 = vsyncadd (%p3071_p8), %s403_s23, 4294967232  ;;  %p3072_p9 = scmp.eq.s32.totalorder %s2480_s18, 0 }
 0x131   : > { %2277 = dma.done.wait (%p3072_p9), [#allocation12], 64   ;;  %p3073_p11 = pmov %p3072_p9 }
 0x132   : > { %p3074_p1 = pmov %p3072_p9 }
 0x133   : > { %2279 = vsyncadd (%p3073_p11), [#allocation12], 4294967232 }
 0x134   : > { %2281 = dma.done.wait (%p3074_p1), [#allocation15], 128   ;;  %p3075_p10 = pmov %p3074_p1 }
 0x135   : > { %p3076_p12 = pmov %p3074_p1 }
 0x136   : > { %2283 = vsyncadd (%p3075_p10), [#allocation15], 4294967168 }
 0x137   : > { %2285 = dma.done.wait (%p3076_p12), [#allocation18], 128   ;;  %p3077_p0 = pmov %p3074_p1 }
 0x139   : > { %2287 = vsyncadd (%p3077_p0), [#allocation18], 4294967168  ;;  %p3078_p6 = pmov %p3077_p0 }
 0x13a   : > { %p3079_p13 = pmov %p3077_p0 }
 0x13b   : > { %2289 = dma.done.wait (%p3078_p6), [#allocation21], 64  }
 0x13c   : > { %2291 = vsyncadd (%p3079_p13), [#allocation21], 4294967232  ;;  %s3080_s19 = sld [smem:[#allocation31_spill]]  ;;  %v2836_v0 = vld [vmem:[#allocation13] sm:$0xf]  ;;  %s2840_s13 = scalar_lea.vmem [#allocation22], %s1528_s12 }
 0x13d   : > { %v2838_v1 = vld [vmem:[#allocation14] sm:$0xf]  ;;  %s3081_s4 = sld [smem:[#allocation32_spill]] }
 0x142   : > { %s1537_s3 = sshll.u32 %s3080_s19, 7 }
 0x143   : > { %p1538_p2 = scmp.ne.s32.totalorder %s3081_s4, 0 }
 0x144   : > { %v2356_v2 = vmov (!%p1538_p2), 0   ;;  %v2357_v3 = vmov (!%p1538_p2), 0.0   ;;  %vm2358_vm0 = vmmov (!%p1538_p2), 0   ;;  %v477_v4 = vld [vmem:[%s406_s21] sm:$0xf] (!%p1538_p2)  ;;  %vm478_vm1 = vcmask (!%p1538_p2), 1043456  }
 0x145   : > { %476 = sbr.rel (%p1538_p2) target bundleno = 674 (0x2a2), region = 88  ;;  %1918 = vset.pattern.permute.xlu0 (!%p1538_p2), %v2356_v2  ;;  %1617 = vmatprep.subr.mxu0 (!%p1538_p2), %v2357_v3  ;;  %v479_v5 = vsel (!%p1538_p2), %vm478_vm1, %v477_v4, 0.0  ;;  %v513_v30 = vld [vmem:[#allocation17] sm:$0xf] (!%p1538_p2)  ;;  %vm514_vm2 = vcmask (!%p1538_p2), 31744   ;;  %s591_s8 = sshra.s32 (!%p1538_p2), %s1537_s3, 7 }
 0x146   : > { %503 = vperm.xlu0 (!%p1538_p2), %1918, %v2836_v0   ;;  %1622 = vmatprep.subr.mxu1 (!%p1538_p2), %v2357_v3  ;;  %v480_v6 = vrot.slane (!%p1538_p2), %v479_v5, 4  ;;  %v596_v31 = vld [vmem:[#allocation19] sm:$0xf] (!%p1538_p2)  ;;  %s1541_s12 = sshll.u32 (!%p1538_p2), %s591_s8, 2 }
 0x147   : > { %1619 = vmatprep.mubr.msk.f32.mxu0 (!%p1538_p2), %vm2358_vm0, %v2357_v3  ;;  %1624 = vmatprep.mubr.msk.f32.mxu1 (!%p1538_p2), %vm2358_vm0, %v2357_v3  ;;  %s594_s26 = scalar_lea.vmem (!%p1538_p2), [#allocation3], %s1541_s12  ;;  %s671_s2 = scalar_lea.vmem (!%p1538_p2), [#allocation4], %s1541_s12 }
 0x148   : > { %v481_v7 = vadd.f32 (!%p1538_p2), %v480_v6, %v479_v5 }
 0x14a   : > { %509 = vperm.xlu0 (!%p1538_p2), %1918, %v2838_v1   ;;  %v482_v8 = vrot.slane (!%p1538_p2), %v481_v7, 2 }
 0x14c   : > { %v483_v9 = vadd.f32 %v482_v8, %v481_v7 }
 0x14e   : > { %v484_v10 = vrot.slane %v483_v9, 1 }
 0x150   : > { %v485_v11 = vadd.f32 %v484_v10, %v483_v9 }
 0x152   : > { %v487_v12 = vmul.f32 0.25, %v485_v11 }
 0x154   : > { %v488_v13 = vsub.f32 %v477_v4, %v487_v12 }
 0x156   : > { %v489_v14 = vmul.f32 %v488_v13, %v488_v13 }
 0x158   : > { %v490_v15 = vsel %vm478_vm1, %v489_v14, 0.0 }
 0x159   : > { %v491_v16 = vrot.slane %v490_v15, 4 }
 0x15b   : > { %v492_v17 = vadd.f32 %v491_v16, %v490_v15 }
 0x15d   : > { %v493_v18 = vrot.slane %v492_v17, 2 }
 0x15f   : > { %v494_v19 = vadd.f32 %v493_v18, %v492_v17 }
 0x161   : > { %v495_v20 = vrot.slane %v494_v19, 1 }
 0x163   : > { %v496_v21 = vadd.f32 %v495_v20, %v494_v19 }
 0x165   : > { %v497_v22 = vmul.f32 0.25, %v496_v21 }
 0x167   : > { %v498_v23 = vadd.f32 1e-05, %v497_v22 }
 0x169   : > { %1919 = vrsqrt.f32 %v498_v23 }
 0x173   : > { %v1920_v24 = vpop.eup %1919 }
 0x174   : > { %v500_v25 = vmul.f32 %v1920_v24, %v488_v13 }
 0x1c5   : > { %v504_v26 = vpop.permute.xlu0 %503 }
 0x1c6   : > { %v506_v27 = vmul.f32 %v504_v26, %v500_v25 }
 0x1c9   : > { %v510_v28 = vpop.permute.xlu0 %509 }
 0x1ca   : > { %v512_v29 = vadd.f32 %v510_v28, %v506_v27 }
 0x1cc   : > { %1618 = vmatpush3.msk.msra.mxu0 %vm478_vm1, %v512_v29  ;;  %1623 = vmatpush3.msk.msra.mxu1 %vm478_vm1, %v512_v29 }
 0x1cd   : > { %1620 = vmatmul.mubr.msk.f32.vlgmr.msra.gmra.mrb[0].mxu0 %vm514_vm2, %v513_v30  ;;  %1625 = vmatmul.mubr.msk.f32.vlgmr.msra.gmra.mrb[0].mxu1 %vm514_vm2, %v596_v31 }
 0x2a0   : > { %v587_v32 = vpop.f32.mrb[0].mxu0  ;;  %v666_v33 = vpop.f32.mrb[0].mxu1 }
 0x2a1   : > { %595 = vst [vmem:[%s594_s26] sm:$0xf] %v587_v32  ;;  %672 = vst [vmem:[%s671_s2] sm:$0xf] %v666_v33  ;;  %v1621_v34 = vpop.f32.mrb[1].mxu0  ;;  %v1626_v35 = vpop.f32.mrb[1].mxu1 }
 0x2a2 PF: > { %s3083_s5 = sld [smem:[#allocation31_spill]] }
 0x2a8   : > { %p1545_p5 = scmp.ne.s32.totalorder %s3083_s5, 0 }
 0x2a9   : > { %v2359_v36 = vmov (!%p1545_p5), 0   ;;  %v2360_v37 = vmov (!%p1545_p5), 0.0   ;;  %vm2361_vm3 = vmmov (!%p1545_p5), 0   ;;  %v677_v38 = vld [vmem:[%s2804_s27] sm:$0xf] (!%p1545_p5)  ;;  %vm678_vm4 = vcmask (!%p1545_p5), 1043456  }
 0x2aa   : > { %676 = sbr.rel (%p1545_p5) target bundleno = 1031 (0x407), region = 92  ;;  %1921 = vset.pattern.permute.xlu0 (!%p1545_p5), %v2359_v36  ;;  %1627 = vmatprep.subr.mxu0 (!%p1545_p5), %v2360_v37  ;;  %793 = vst [vmem:[#allocation6] sm:$0x1] (!%p1545_p5), %v2360_v37  ;;  %794 = vst [vmem:[#allocation7] sm:$0xf] (!%p1545_p5), %v2360_v37  ;;  %v679_v39 = vsel (!%p1545_p5), %vm678_vm4, %v677_v38, 0.0 }
 0x2ab   : > { %703 = vperm.xlu0 (!%p1545_p5), %1921, %v2836_v0   ;;  %1629 = vmatprep.mubr.msk.f32.mxu0 (!%p1545_p5), %vm2361_vm3, %v2360_v37  ;;  %v680_v40 = vrot.slane (!%p1545_p5), %v679_v39, 4  ;;  %v713_v0 = vld [vmem:[#allocation16] sm:$0xf] (!%p1545_p5)  ;;  %vm714_vm5 = vcmask (!%p1545_p5), 31744  }
 0x2ad   : > { %v681_v41 = vadd.f32 (!%p1545_p5), %v680_v40, %v679_v39 }
 0x2af   : > { %709 = vperm.xlu0 (!%p1545_p5), %1921, %v2838_v1   ;;  %v682_v42 = vrot.slane (!%p1545_p5), %v681_v41, 2  ;;  %v2362_v1 = vmov (!%p1545_p5), -inf  }
 0x2b0   : > { %792 = vst [vmem:[#allocation5] sm:$0x1] (!%p1545_p5), %v2362_v1 }
 0x2b1   : > { %v683_v43 = vadd.f32 %v682_v42, %v681_v41 }
 0x2b3   : > { %v684_v44 = vrot.slane %v683_v43, 1 }
 0x2b5   : > { %v685_v45 = vadd.f32 %v684_v44, %v683_v43 }
 0x2b7   : > { %v687_v46 = vmul.f32 0.25, %v685_v45 }
 0x2b9   : > { %v688_v47 = vsub.f32 %v677_v38, %v687_v46 }
 0x2bb   : > { %v689_v48 = vmul.f32 %v688_v47, %v688_v47 }
 0x2bd   : > { %v690_v49 = vsel %vm678_vm4, %v689_v48, 0.0 }
 0x2be   : > { %v691_v50 = vrot.slane %v690_v49, 4 }
 0x2c0   : > { %v692_v51 = vadd.f32 %v691_v50, %v690_v49 }
 0x2c2   : > { %v693_v52 = vrot.slane %v692_v51, 2 }
 0x2c4   : > { %v694_v53 = vadd.f32 %v693_v52, %v692_v51 }
 0x2c6   : > { %v695_v54 = vrot.slane %v694_v53, 1 }
 0x2c8   : > { %v696_v55 = vadd.f32 %v695_v54, %v694_v53 }
 0x2ca   : > { %v697_v56 = vmul.f32 0.25, %v696_v55 }
 0x2cc   : > { %v698_v57 = vadd.f32 1e-05, %v697_v56 }
 0x2ce   : > { %1922 = vrsqrt.f32 %v698_v57 }
 0x2d8   : > { %v1923_v58 = vpop.eup %1922 }
 0x2d9   : > { %v700_v59 = vmul.f32 %v1923_v58, %v688_v47 }
 0x32a   : > { %v704_v60 = vpop.permute.xlu0 %703 }
 0x32b   : > { %v706_v61 = vmul.f32 %v704_v60, %v700_v59 }
 0x32e   : > { %v710_v62 = vpop.permute.xlu0 %709 }
 0x32f   : > { %v712_v63 = vadd.f32 %v710_v62, %v706_v61 }
 0x331   : > { %1628 = vmatpush3.msk.msra.mxu0 %vm678_vm4, %v712_v63 }
 0x332   : > { %1630 = vmatmul.mubr.msk.f32.vlgmr.msra.gmra.mrb[0].mxu0 %vm714_vm5, %v713_v0 }
 0x405   : > { %v787_v2 = vpop.f32.mrb[0].mxu0 }
 0x406   : > { %791 = vst [vmem:[#allocation2] sm:$0xf] %v787_v2  ;;  %v1631_v3 = vpop.f32.mrb[1].mxu0 }
 0x407 PF: > { %s3084_s6 = sld [smem:[#allocation31_spill]]  ;;  %s2860_s23 = sshra.s32 %s1537_s3, 7  ;;  %vm885_vm6 = vcmask 1043456   ;;  %vm836_vm7 = vcmask 31744   ;;  %v2363_v22 = vmov 0.0|0.0   ;;  %vm2364_vm8 = vmmov 0  }
 0x408   : > { %s1548_s21 = sshll.u32 %s2860_s23, 2  ;;  %1698 = vmatprep.subr.bf16.mxu1 %v2363_v22  ;;  %v2365_v27 = vmov 0.0   ;;  %v1061_v57 = vlaneseq }
 0x409   : > { %s798_s19 = scalar_lea.vmem [#allocation3], %s1548_s21  ;;  %1690 = vmatprep.mubr.msk.f32.mxu1 %vm2364_vm8, %v2365_v27  ;;  %s801_s3 = scalar_lea.vmem [#allocation4], %s1548_s21 }
 0x40a   : > { %v799_v4 = vld [vmem:[%s798_s19] sm:$0xf]  ;;  %v1062_v60 = vshrl.u32 %v1061_v57, 7 }
 0x40b   : > { %804 = vxpose.xlu0.b32.start.end [1/1] (short) %v799_v4, 128 }
 0x40c   : > { %v2908_v0 = vsub.s32 0, %v1062_v60 }
 0x40d   : > { %v803_v5 = vld [vmem:[#allocation2] sm:$0xf]  ;;  %v1034_v62 = vld [vmem:[#allocation5] sm:$0x1]  ;;  %p1567_p4 = scmp.ne.s32.totalorder %s3084_s6, 1 }
 0x40e   : > { %1632 = vmatprep.subr.msk.mxu0 %vm885_vm6, %v803_v5  ;;  %vm2367_vm9 = vmmov (!%p1567_p4), 0  }
 0x40f   : > { %1633 = vmatpush3.msk.msra.mxu0 %vm885_vm6, %v803_v5 }
 0x48b   : > { %v820_v6 = vpop.trf.xlu0 }
 0x48c   : > { %1634 = vmatprep.mubr.msk.f32.mxu0 %vm836_vm7, %v820_v6 }
 0x48f   : > { %v821_v7 = vpop.trf.xlu0 }
 0x490   : > { %1635 = vmatmul.mubr.msk.f32.vlgmr.msra.gmra.mrb[0].mxu0 %vm836_vm7, %v821_v7 }
 0x493   : > { %v822_v8 = vpop.trf.xlu0 }
 0x494   : > { %1637 = vmatprep.mubr.msk.f32.mxu0 %vm836_vm7, %v822_v8 }
 0x497   : > { %v823_v9 = vpop.trf.xlu0 }
 0x498   : > { %1638 = vmatmul.mubr.msk.f32.gmra.mrb[2].mxu0 %vm836_vm7, %v823_v9 }
 0x49b   : > { %v824_v10 = vpop.trf.xlu0 }
 0x49c   : > { %1640 = vmatprep.mubr.msk.f32.mxu0 %vm836_vm7, %v824_v10 }
 0x49f   : > { %v825_v11 = vpop.trf.xlu0 }
 0x4a0   : > { %1641 = vmatmul.mubr.msk.f32.gmra.mrb[4].mxu0 %vm836_vm7, %v825_v11 }
 0x4a3   : > { %v826_v12 = vpop.trf.xlu0 }
 0x4a4   : > { %1643 = vmatprep.mubr.msk.f32.mxu0 %vm836_vm7, %v826_v12 }
 0x4a7   : > { %v827_v13 = vpop.trf.xlu0 }
 0x4a8   : > { %1644 = vmatmul.mubr.msk.f32.gmra.mrb[6].mxu0 %vm836_vm7, %v827_v13 }
 0x4ab   : > { %v828_v14 = vpop.trf.xlu0 }
 0x4ac   : > { %1646 = vmatprep.mubr.msk.f32.mxu0 %vm836_vm7, %v828_v14 }
 0x4af   : > { %v829_v15 = vpop.trf.xlu0 }
 0x4b0   : > { %1647 = vmatmul.mubr.msk.f32.gmra.mrb[8].mxu0 %vm836_vm7, %v829_v15 }
 0x4b3   : > { %v830_v16 = vpop.trf.xlu0 }
 0x4b4   : > { %1649 = vmatprep.mubr.msk.f32.mxu0 %vm836_vm7, %v830_v16 }
 0x4b7   : > { %v831_v17 = vpop.trf.xlu0 }
 0x4b8   : > { %1650 = vmatmul.mubr.msk.f32.gmra.mrb[10].mxu0 %vm836_vm7, %v831_v17 }
 0x4bb   : > { %v832_v18 = vpop.trf.xlu0 }
 0x4bc   : > { %1652 = vmatprep.mubr.msk.f32.mxu0 %vm836_vm7, %v832_v18 }
 0x4bf   : > { %v833_v19 = vpop.trf.xlu0 }
 0x4c0   : > { %1653 = vmatmul.mubr.msk.f32.gmra.mrb[12].mxu0 %vm836_vm7, %v833_v19 }
 0x4c3   : > { %v834_v20 = vpop.trf.xlu0 }
 0x4c4   : > { %1655 = vmatprep.mubr.msk.f32.mxu0 %vm836_vm7, %v834_v20 }
 0x4c7   : > { %v835_v21 = vpop.trf.xlu0 }
 0x4c8   : > { %1656 = vmatmul.mubr.msk.f32.gmra.mrb[14].mxu0 %vm836_vm7, %v835_v21 }
 0x563   : > { %v2884_v23 = vpop.f32.mrb[0].mxu0 }
 0x564   : > { %v955_v24 = vpop.f32.mrb[1].mxu0 }
 0x56b   : > { %v2886_v25 = vpop.f32.mrb[2].mxu0 }
 0x56c   : > { %v965_v26 = vpop.f32.mrb[3].mxu0 }
 0x573   : > { %v2888_v28 = vpop.f32.mrb[4].mxu0 }
 0x574   : > { %v1036_v29 = vmax.f32 %v2884_v23, %v2888_v28  ;;  %v975_v30 = vpop.f32.mrb[5].mxu0 }
 0x575   : > { %v1035_v31 = vmax.f32 %v955_v24, %v975_v30 }
 0x57b   : > { %v2892_v32 = vpop.f32.mrb[6].mxu0 }
 0x57c   : > { %v1038_v33 = vmax.f32 %v2886_v25, %v2892_v32  ;;  %v985_v34 = vpop.f32.mrb[7].mxu0 }
 0x57d   : > { %v1037_v35 = vmax.f32 %v965_v26, %v985_v34 }
 0x583   : > { %v2896_v36 = vpop.f32.mrb[8].mxu0 }
 0x584   : > { %v1040_v37 = vmax.f32 %v1036_v29, %v2896_v36  ;;  %v995_v38 = vpop.f32.mrb[9].mxu0 }
 0x585   : > { %v1039_v39 = vmax.f32 %v1035_v31, %v995_v38 }
 0x58b   : > { %v2899_v40 = vpop.f32.mrb[10].mxu0 }
 0x58c   : > { %v1042_v41 = vmax.f32 %v1038_v33, %v2899_v40  ;;  %v1005_v42 = vpop.f32.mrb[11].mxu0 }
 0x58d   : > { %v1041_v43 = vmax.f32 %v1037_v35, %v1005_v42 }
 0x593   : > { %v2902_v44 = vpop.f32.mrb[12].mxu0 }
 0x594   : > { %v1044_v45 = vmax.f32 %v1040_v37, %v2902_v44  ;;  %v1015_v46 = vpop.f32.mrb[13].mxu0 }
 0x595   : > { %v1043_v47 = vmax.f32 %v1039_v39, %v1015_v46 }
 0x597   : > { %v1047_v48 = vmax.f32 %v1043_v47, %v1044_v45 }
 0x59b   : > { %v2905_v49 = vpop.f32.mrb[14].mxu0 }
 0x59c   : > { %v1046_v50 = vmax.f32 %v1042_v41, %v2905_v49  ;;  %v1025_v51 = vpop.f32.mrb[15].mxu0 }
 0x59d   : > { %v1045_v52 = vmax.f32 %v1041_v43, %v1025_v51 }
 0x59f   : > { %v1048_v53 = vmax.f32 %v1045_v52, %v1046_v50 }
 0x5a1   : > { %v1049_v54 = vmax.f32 %v1047_v48, %v1048_v53 }
 0x5a3   : > { %v1050_v55 = vrot.slane %v1049_v54, 4 }
 0x5a5   : > { %v1051_v56 = vmax.f32 %v1049_v54, %v1050_v55 }
 0x5a7   : > { %v1052_v58 = vrot.slane %v1051_v56, 2 }
 0x5a9   : > { %v1053_v59 = vmax.f32 %v1051_v56, %v1052_v58 }
 0x5ab   : > { %v1054_v61 = vrot.slane %v1053_v59, 1 }
 0x5ad   : > { %v1055_v63 = vmax.f32 %v1053_v59, %v1054_v61 }
 0x5af   : > { %v1056_v1 = vmax.f32 %v1034_v62, %v1055_v63 }
 0x5b1   : > { %v1064_v2 = vrot.slane %v1056_v1, %v2908_v0  ;;  %1219 = vst [vmem:[#allocation5] sm:$0x1] %v1056_v1  ;;  %v1057_v33 = vsub.f32 %v1034_v62, %v1056_v1 }
 0x5b3   : > { %v1066_v3 = vsub.f32 %v955_v24, %v1064_v2  ;;  %v1067_v4 = vsub.f32 %v2884_v23, %v1064_v2  ;;  %v1068_v5 = vsub.f32 %v965_v26, %v1064_v2  ;;  %v1069_v6 = vsub.f32 %v2886_v25, %v1064_v2 }
 0x5b4   : > { %v1070_v7 = vsub.f32 %v975_v30, %v1064_v2  ;;  %v1071_v8 = vsub.f32 %v2888_v28, %v1064_v2  ;;  %v1072_v9 = vsub.f32 %v985_v34, %v1064_v2  ;;  %v1073_v10 = vsub.f32 %v2892_v32, %v1064_v2 }
 0x5b5   : > { %v1074_v11 = vsub.f32 %v995_v38, %v1064_v2  ;;  %v1075_v12 = vsub.f32 %v2896_v36, %v1064_v2  ;;  %v1076_v13 = vsub.f32 %v1005_v42, %v1064_v2  ;;  %v1077_v14 = vsub.f32 %v2899_v40, %v1064_v2 }
 0x5b6   : > { %v1078_v15 = vsub.f32 %v1015_v46, %v1064_v2  ;;  %v1079_v16 = vsub.f32 %v2902_v44, %v1064_v2  ;;  %v1080_v17 = vsub.f32 %v1025_v51, %v1064_v2  ;;  %v1081_v18 = vsub.f32 %v2905_v49, %v1064_v2 }
 0x5b7   : > { %v1082_v19 = vmul.f32 1.442695, %v1066_v3  ;;  %v1084_v20 = vmul.f32 1.442695, %v1067_v4  ;;  %v1086_v21 = vmul.f32 1.442695, %v1068_v5 }
 0x5b8   : > { %v1088_v23 = vmul.f32 1.442695, %v1069_v6  ;;  %v1090_v24 = vmul.f32 1.442695, %v1070_v7  ;;  %v1092_v25 = vmul.f32 1.442695, %v1071_v8 }
 0x5b9   : > { %1924 = vpow2.f32 %v1082_v19  ;;  %v1094_v26 = vmul.f32 1.442695, %v1072_v9  ;;  %v1096_v27 = vmul.f32 1.442695, %v1073_v10  ;;  %v1098_v28 = vmul.f32 1.442695, %v1074_v11 }
 0x5ba   : > { %1926 = vpow2.f32 %v1084_v20  ;;  %v1100_v29 = vmul.f32 1.442695, %v1075_v12  ;;  %v1102_v30 = vmul.f32 1.442695, %v1076_v13  ;;  %v1104_v31 = vmul.f32 1.442695, %v1077_v14 }
 0x5bb   : > { %1928 = vpow2.f32 %v1086_v21  ;;  %v1106_v32 = vmul.f32 1.442695, %v1078_v15  ;;  %v1108_v34 = vmul.f32 1.442695, %v1079_v16  ;;  %v1110_v36 = vmul.f32 1.442695, %v1080_v17 }
 0x5bc   : > { %1930 = vpow2.f32 %v1088_v23  ;;  %v1112_v38 = vmul.f32 1.442695, %v1081_v18  ;;  %v1058_v42 = vmul.f32 1.442695, %v1057_v33  ;;  %v802_v17 = vld [vmem:[%s801_s3] sm:$0xf] }
 0x5bd   : > { %1932 = vpow2.f32 %v1090_v24  ;;  %v1114_v21 = vld [vmem:[#allocation6] sm:$0x1] }
 0x5be   : > { %1934 = vpow2.f32 %v1092_v25 }
 0x5bf   : > { %1936 = vpow2.f32 %v1094_v26 }
 0x5c0   : > { %1938 = vpow2.f32 %v1096_v27  ;;  %v1139_v27 = vld [vmem:[#allocation7] sm:$0xf] }
 0x5c1   : > { %1940 = vpow2.f32 %v1098_v28 }
 0x5c2   : > { %1942 = vpow2.f32 %v1100_v29 }
 0x5c3   : > { %v1925_v35 = vpop.eup %1924  ;;  %1944 = vpow2.f32 %v1102_v30 }
 0x5c4   : > { %v1927_v37 = vpop.eup %1926  ;;  %1946 = vpow2.f32 %v1104_v31 }
 0x5c5   : > { %v1929_v39 = vpop.eup %1928  ;;  %1948 = vpow2.f32 %v1106_v32  ;;  %v1116_v40 = vadd.f32 %v1927_v37, %v1925_v35  ;;  %v1699_v41 = vpack.c.bf16 %v1927_v37, %v1925_v35  ;;  %v2366_v32 = vmov (!%p1567_p4), 0.0   ;;  %v1235_v37 = vld [vmem:[#allocation20] sm:$0xf] (!%p1567_p4) }
 0x5c6   : > { %v1931_v43 = vpop.eup %1930  ;;  %1950 = vpow2.f32 %v1108_v34  ;;  %1693 = vmatprep.subr.mxu0 (!%p1567_p4), %v2366_v32  ;;  %1695 = vmatprep.mubr.msk.f32.mxu0 (!%p1567_p4), %vm2367_vm9, %v2366_v32 }
 0x5c7   : > { %v1933_v44 = vpop.eup %1932  ;;  %1952 = vpow2.f32 %v1110_v36  ;;  %v1117_v45 = vadd.f32 %v1929_v39, %v1116_v40  ;;  %1700 = vmatpush3.bf16.msra.mxu1 %v1699_v41  ;;  %v1702_v46 = vpack.c.bf16 %v1931_v43, %v1929_v39 }
 0x5c8   : > { %v1935_v47 = vpop.eup %1934  ;;  %1954 = vpow2.f32 %v1112_v38  ;;  %1701 = vmatprep.subr.bf16.mxu1 %v2363_v22  ;;  %v1236_v38 = vld [vmem:[%s2804_s27] sm:$0xf] (!%p1567_p4) }
 0x5c9   : > { %v1937_v48 = vpop.eup %1936  ;;  %v1118_v49 = vadd.f32 %v1931_v43, %v1117_v45  ;;  %v1705_v50 = vpack.c.bf16 %v1935_v47, %v1933_v44  ;;  %1956 = vpow2.f32 %v1058_v42 }
 0x5ca   : > { %v1939_v51 = vpop.eup %1938 }
 0x5cb   : > { %v1941_v52 = vpop.eup %1940  ;;  %v1119_v53 = vadd.f32 %v1933_v44, %v1118_v49  ;;  %1703 = vmatpush3.bf16.msra.mxu1 %v1702_v46  ;;  %v1708_v54 = vpack.c.bf16 %v1939_v51, %v1937_v48 }
 0x5cc   : > { %v1943_v55 = vpop.eup %1942  ;;  %1704 = vmatprep.subr.bf16.mxu1 %v2363_v22 }
 0x5cd   : > { %v1945_v56 = vpop.eup %1944  ;;  %v1120_v57 = vadd.f32 %v1935_v47, %v1119_v53  ;;  %v1711_v58 = vpack.c.bf16 %v1943_v55, %v1941_v52 }
 0x5ce   : > { %v1947_v59 = vpop.eup %1946 }
 0x5cf   : > { %v1949_v60 = vpop.eup %1948  ;;  %v1121_v61 = vadd.f32 %v1937_v48, %v1120_v57  ;;  %1706 = vmatpush3.bf16.msra.mxu1 %v1705_v50  ;;  %v1714_v62 = vpack.c.bf16 %v1947_v59, %v1945_v56 }
 0x5d0   : > { %v1951_v63 = vpop.eup %1950  ;;  %1707 = vmatprep.subr.bf16.mxu1 %v2363_v22 }
 0x5d1   : > { %v1953_v1 = vpop.eup %1952  ;;  %v1122_v2 = vadd.f32 %v1939_v51, %v1121_v61  ;;  %v1717_v3 = vpack.c.bf16 %v1951_v63, %v1949_v60 }
 0x5d2   : > { %v1955_v4 = vpop.eup %1954 }
 0x5d3   : > { %v1957_v5 = vpop.eup %1956  ;;  %v1123_v6 = vadd.f32 %v1941_v52, %v1122_v2  ;;  %1709 = vmatpush3.bf16.msra.mxu1 %v1708_v54  ;;  %v1720_v7 = vpack.c.bf16 %v1955_v4, %v1953_v1 }
 0x5d4   : > { %1710 = vmatprep.subr.bf16.mxu1 %v2363_v22  ;;  %v1144_v8 = vrot.slane %v1957_v5, %v2908_v0  ;;  %v1115_v25 = vmul.f32 %v1957_v5, %v1114_v21 }
 0x5d5   : > { %v1124_v9 = vadd.f32 %v1943_v55, %v1123_v6 }
 0x5d6   : > { %v1146_v28 = vmul.f32 %v1144_v8, %v1139_v27 }
 0x5d7   : > { %v1125_v10 = vadd.f32 %v1945_v56, %v1124_v9  ;;  %1712 = vmatpush3.bf16.msra.mxu1 %v1711_v58 }
 0x5d8   : > { %1713 = vmatprep.subr.bf16.mxu1 %v2363_v22 }
 0x5d9   : > { %v1126_v11 = vadd.f32 %v1947_v59, %v1125_v10 }
 0x5db   : > { %v1127_v12 = vadd.f32 %v1949_v60, %v1126_v11  ;;  %1715 = vmatpush3.bf16.msra.mxu1 %v1714_v62 }
 0x5dc   : > { %1716 = vmatprep.subr.bf16.mxu1 %v2363_v22 }
 0x5dd   : > { %v1128_v13 = vadd.f32 %v1951_v63, %v1127_v12 }
 0x5df   : > { %v1129_v14 = vadd.f32 %v1953_v1, %v1128_v13  ;;  %1718 = vmatpush3.bf16.msra.mxu1 %v1717_v3 }
 0x5e0   : > { %1719 = vmatprep.subr.bf16.mxu1 %v2363_v22 }
 0x5e1   : > { %v1130_v15 = vadd.f32 %v1955_v4, %v1129_v14 }
 0x5e3   : > { %v1131_v16 = vrot.slane %v1130_v15, 4  ;;  %1721 = vmatpush3.bf16.msra.mxu1 %v1720_v7 }
 0x5e5   : > { %v1132_v18 = vadd.f32 %v1131_v16, %v1130_v15 }
 0x5e6   : > { %1691 = vmatmul.mubr.f32.vlgmr.msra.gmra.mrb[0].mxu1 %v802_v17 }
 0x5e7   : > { %v1133_v19 = vrot.slane %v1132_v18, 2 }
 0x5e9   : > { %v1134_v20 = vadd.f32 %v1133_v19, %v1132_v18 }
 0x5eb   : > { %v1135_v23 = vrot.slane %v1134_v20, 1 }
 0x5ed   : > { %v1136_v24 = vadd.f32 %v1135_v23, %v1134_v20 }
 0x5ef   : > { %v1137_v26 = vadd.f32 %v1136_v24, %v1115_v25 }
 0x5f1   : > { %1138 = vst [vmem:[#allocation6] sm:$0x1] %v1137_v26 }
 0x5f8   : > { %v1224_v31 = vld [vmem:[#allocation6] sm:$0x1] (!%p1567_p4) }
 0x5f9   : > { %1958 = vrcp.f32 (!%p1567_p4), %v1224_v31 }
 0x603   : > { %v1959_v33 = vpop.eup (!%p1567_p4), %1958 }
 0x604   : > { %v1232_v35 = vrot.slane (!%p1567_p4), %v1959_v33, %v2908_v0 }
 0x6b6   : > { %1223 = sbr.rel (%p1567_p4) target bundleno = 1950 (0x79e), region = 96 }
 0x6b9   : > { %v1213_v29 = vpop.f32.mrb[0].mxu1 }
 0x6ba   : > { %v1217_v22 = vadd.f32 %v1213_v29, %v1146_v28  ;;  %v1692_v30 = vpop.f32.mrb[1].mxu1 }
 0x6bc   : > { %1218 = vst [vmem:[#allocation7] sm:$0xf] %v1217_v22 }
 0x6c3   : > { %v1227_v34 = vld [vmem:[#allocation7] sm:$0xf] }
 0x6c4   : > { %v1234_v36 = vmul.f32 %v1232_v35, %v1227_v34 }
 0x6c6   : > { %1694 = vmatpush3.msk.msra.mxu0 %vm885_vm6, %v1234_v36 }
 0x6c7   : > { %1696 = vmatmul.mubr.msk.f32.vlgmr.msra.gmra.mrb[0].mxu0 %vm836_vm7, %v1235_v37 }
 0x79a   : > { %v1309_v39 = vpop.f32.mrb[0].mxu0 }
 0x79b   : > { %v1310_v40 = vadd.f32 %v1309_v39, %v1236_v38  ;;  %v1697_v41 = vpop.f32.mrb[1].mxu0 }
 0x79d   : > { %1313 = vst [vmem:[%s2840_s13] sm:$0xf] %v1310_v40 }
 0x79e PF: > { %s3085_s4 = sld [smem:[#allocation33_spill]]  ;;  %s3086_s18 = sld [smem:[#allocation32_spill]] }
 0x79f   : > { %s1330_s26 = sshll.u32 %s2840_s13, 4  ;;  %s3087_s23 = sld [smem:[#allocation44_spill]]  ;;  %s2938_s26 = int_to_ptr.vmem [resolvable:$true] %s1330_s26 }
 0x7a0   : > { %s1315_s21 = scalar_lea.sflag [#allocation10], %s2800_s20  ;;  %s2188_s19 = scalar_lea.vmem %s2938_s26, 64 }
 0x7a1   : > { %p2189_p7 = scmp.ne.s32.totalorder %s2938_s26, %s2188_s19  ;;  %p3088_p3 = scmp.ne.s32.totalorder %s3057_s11, 0 }
 0x7a2   : > { %s2368_s3 = smov [#allocation22]  }
 0x7a3   : > { %p2190_p8 = pnand %p2189_p7, %p3088_p3 }
 0x7a4   : > { %s1571_s8 = sshll.u32 %s3085_s4, 1  ;;  %s2192_s4 = sshll.u32 %s2368_s3, 4  ;;  %s2193_s4 = int_to_ptr.vmem [resolvable:$false] %s2192_s4 }
 0x7a5   : > { %s1326_s12 = sadd.s32 %s3086_s18, %s1571_s8  ;;  %p2191_p9 = pneg %p2190_p8 }
 0x7a6   : > { %s1572_s2 = sshll.u32 %s1326_s12, 6  ;;  %s2194_s13 = scalar_lea.vmem %s2193_s4, 128 }
 0x7a7   : > { %s1328_s27 = scalar_lea.hbm %s3087_s23, %s1572_s2  ;;  %p2195_p11 = scmp.lt.s32.totalorder %s2938_s26, %s2193_s4 }
 0x7a8   : > { %p2196_p1 = scmp.lt.s32.totalorder %s2194_s13, %s2188_s19 }
 0x7aa   : > { %p2197_p10 = por %p2196_p1, %p2195_p11 }
 0x7ac   : > { %p2198_p12 = pnand %p2197_p10, %p2191_p9 }
 0x7ae   : > { %2201 = shalt.err (!%p2198_p12)
}
 0x7af   : > { %s2202_s18 = scalar_lea.hbm %s1328_s27, 64  ;;  %s2206_s12 = scalar_lea.hbm %s3087_s23, 256 }
 0x7b0   : > { %p2203_p0 = scmp.ne.s32.totalorder %s1328_s27, %s2202_s18  ;;  %p2207_p2 = scmp.lt.u32.totalorder %s1328_s27, %s3087_s23 }
 0x7b1   : > { %p2208_p5 = scmp.lt.u32.totalorder %s2206_s12, %s2202_s18  ;;  %p2210_p7 = scmp.lt.u32.totalorder %s2202_s18, %s1328_s27 }
 0x7b2   : > { %p2204_p6 = pnand %p2203_p0, %p3088_p3 }
 0x7b3   : > { %p2209_p4 = por %p2208_p5, %p2207_p2 }
 0x7b4   : > { %p2205_p13 = pneg %p2204_p6 }
 0x7b5   : > { %p2211_p8 = por %p2210_p7, %p2209_p4 }
 0x7b7   : > { %p2212_p9 = pnand %p2211_p8, %p2205_p13 }
 0x7b9   : > { %2215 = shalt.err (!%p2212_p9)
}
 0x7ba   : > { %1750 = dma.vmem_to_hbm [thread:$0]  (%p3088_p3), %s2938_s26, 64, %s1328_s27, %s1315_s21  }
 0x7bb PF: > { %p1795_p11 = scmp.ge.s32.totalorder %s2346_s17, 2  ;;  %s1342_s6 = sand.u32 1, %s2310_s30  }
 0x7bc   : > { %p3089_p1 = scmp.ne.s32.totalorder %s3059_s25, 0  ;;  %s1343_s19 = scalar_lea.sflag [#allocation10], %s1342_s6 }
 0x7be   : > { %p1779_p10 = pnand %p1795_p11, %p3089_p1 }
 0x7c0   : > { %2293 = dma.done.wait (!%p1779_p10), %s1343_s19, 64  }
 0x7c1   : > { %2295 = vsyncadd (!%p1779_p10), %s1343_s19, 4294967232  ;;  %s30_s17 = sadd.s32 1, %s2346_s17   ;;  %s3091_s25 = sld [smem:[#allocation35_spill]] }
 0x7c2   : > { %p2965_p12 = scmp.ge.s32.totalorder %s30_s17, 10   ;;  %s3092_s26 = sld [smem:[#allocation36_spill]] }
 0x7c3   : > { %s3093_s27 = smov %s2302_s28  ;;  %s3094_s28 = smov %s2306_s29 }
 0x7c4   : > { %s3095_s29 = smov %s2744_s1  ;;  %s3096_s30 = smov %s2314_s9 }
 0x7c5   : > { %s3097_s9 = smov %s2318_s10  ;;  %s3098_s10 = smov %s2681_s24 }
 0x7c6   : > { %s3099_s11 = smov %s2334_s14  ;;  %s3100_s12 = smov %s2338_s15 }
 0x7c7   : > { %s3101_s13 = smov %s2342_s16  ;;  %s3102_s14 = smov %s3106_s22 }
 0x7c8   : > { %s3103_s15 = smov %s3091_s25  ;;  %s3104_s16 = smov %s3092_s26 }
 0x7c9   :  { %29 = sbr.rel (!%p2965_p12) target bundleno = 24 (0x18), region = 150 }
 0x7d0   :  { %1348 = vsyncpa [#allocation9], 1 }
 0x7d1   :  { %1350 = vsyncpa [#allocation9 + $0x1], 1 }
 0x7d2   :  { %1351 = vsyncpa [#allocation12], 1 }
 0x7d3   :  { %1353 = vsyncpa [#allocation12 + $0x1], 1 }
 0x7d4   :  { %1354 = vsyncpa [#allocation15], 1 }
 0x7d5   :  { %1355 = vsyncpa [#allocation18], 1 }
 0x7d6   :  { %1356 = vsyncpa [#allocation21], 1 }
 0x7d7   :  { %1357 = vsyncpa [#allocation10], 1 }
 0x7d8   :  { %1359 = vsyncpa [#allocation10 + $0x1], 1 }

</bundles_post_ra>
